<compile_context>
chip_gen: v5e
topology: v5e:2x2
jax: 0.10.0
libtpu: 0.0.40
codegen_flags: <defaults>
</compile_context>

<pallas_src>
import jax
import jax.numpy as jnp
from jax import lax
from jax.experimental import pallas as pl
from jax.experimental.pallas import tpu as pltpu


# -----------------------------------------------------------------------------
# Fused kernel:
#   one LSTM recurrence for both heads + fused gamma/beta MLPs
#   + per-channel affine / LeakyReLU(0.2) apply on the full (B*C, HW) tile.
# -----------------------------------------------------------------------------
def dfblk_kernel(y_ref, wih_ref, whh_ref, b_ref,
                 w1_ref, b1_ref, w2_ref, b2_ref,
                 x_ref, o_ref):
    seq = y_ref.shape[0]                  # 8
    H2 = whh_ref.shape[0]                 # 2 * hidden (both heads stacked)
    n4c = w1_ref.shape[1]                 # 4 * C  (gamma0|beta0|gamma1|beta1)
    C = n4c // 4
    BC = x_ref.shape[0]                   # B * C

    y = y_ref[...]                        # (seq, cond_dim)

    # Hoisted input projection for BOTH heads / all gates: one matmul.
    xproj = (jnp.dot(y, wih_ref[...], preferred_element_type=jnp.float32)
             + b_ref[...])                # (seq, 8H) lanes: [i0 i1 f0 f1 o0 o1 g0 g1]

    whh = whh_ref[...]                    # (2H, 8H) block-diagonal across heads

    h = jnp.zeros((1, H2), jnp.float32)   # [h0 | h1]
    c = jnp.zeros((1, H2), jnp.float32)   # [c0 | c1]
    for t in range(seq):                  # static unroll (seq = 8)
        gates = (jnp.dot(h, whh, preferred_element_type=jnp.float32)
                 + xproj[t:t + 1, :])     # (1, 8H)
        # ONE sigmoid over the i/f/o gates of both heads, ONE tanh over g.
        sig = jax.nn.sigmoid(gates[:, :3 * H2])     # (1, 6H)
        g_g = jnp.tanh(gates[:, 3 * H2:])           # (1, 2H)
        i_g = sig[:, 0:H2]
        f_g = sig[:, H2:2 * H2]
        o_g = sig[:, 2 * H2:3 * H2]
        c = f_g * c + i_g * g_g
        h = o_g * jnp.tanh(c)

    # Fused gamma/beta MLPs for both heads: 2 matmuls total.
    mid = jnp.maximum(
        jnp.dot(h, w1_ref[...], preferred_element_type=jnp.float32) + b1_ref[...],
        0.0)                                                    # (1, 4C)
    row = (jnp.dot(mid, w2_ref[...], preferred_element_type=jnp.float32)
           + b2_ref[...])                                       # (1, 4C) = [g0|b0|g1|b1]

    # (1, 4C) row -> four (B*C, 1) columns (channel = row_index % C) via
    # masked lane-reduce; iotas/mask built once, no lane<->sublane relayout.
    r_i = lax.broadcasted_iota(jnp.int32, (BC, n4c), 0)
    l_i = lax.broadcasted_iota(jnp.int32, (BC, n4c), 1)
    ch = r_i % C
    row_b = jnp.broadcast_to(row, (BC, n4c))

    def col(off):
        return jnp.sum(jnp.where(l_i == ch + off, row_b, 0.0),
                       axis=1, keepdims=True)                   # (B*C, 1)

    gam0, bet0 = col(0), col(C)
    gam1, bet1 = col(2 * C), col(3 * C)

    # Fused  leaky(g1 * leaky(g0*x + b0) + b1)  on the full (B*C, HW) tile.
    xb = x_ref[...]                                             # (B*C, HW)
    t0 = gam0 * xb + bet0
    t0 = jnp.where(t0 >= 0, t0, 0.2 * t0)
    t1 = gam1 * t0 + bet1
    o_ref[...] = jnp.where(t1 >= 0, t1, 0.2 * t1)


# -----------------------------------------------------------------------------
# One-time parameter fusion (hoisted out of the forward path).
# Fused gate order along the 8H lane axis: [i0, i1, f0, f1, o0, o1, g0, g1].
# Fused MLP column order along the 4C lane axis: [gamma0, beta0, gamma1, beta1].
# -----------------------------------------------------------------------------
def prepare_fused_params(p0, p1, C, hidden):
    H = hidden
    ps = (p0, p1)
    torch_gate_idx = {"i": 0, "f": 1, "g": 2, "o": 3}   # torch LSTM gate order

    def gate_cols(w, gate):
        k = torch_gate_idx[gate]
        return w[:, k * H:(k + 1) * H]

    fused_order = ("i", "f", "o", "g")                  # sigmoid gates first, tanh last

    # wih: (cond_dim, 8H)
    wih_f = jnp.concatenate(
        [gate_cols(ps[head]["wih"], g) for g in fused_order for head in (0, 1)],
        axis=1)
    # whh: (2H, 8H), block-diagonal across heads within every gate block
    z_hh = jnp.zeros((H, H), jnp.float32)
    cols = []
    for g in fused_order:
        for head in (0, 1):
            blk = gate_cols(ps[head]["whh"], g)         # (H, H)
            cols.append(jnp.concatenate([blk, z_hh] if head == 0 else [z_hh, blk],
                                        axis=0))        # (2H, H)
    whh_f = jnp.concatenate(cols, axis=1)
    # bias: (1, 8H)
    b_f = jnp.concatenate(
        [gate_cols(ps[head]["b"], g) for g in fused_order for head in (0, 1)],
        axis=1)

    # MLP layer 1: (2H, 4C)  columns [g0 | b0 | g1 | b1], rows [head0 ; head1]
    z_hc = jnp.zeros((H, C), jnp.float32)
    w1_f = jnp.concatenate([
        jnp.concatenate([p0["w1g"], p0["w1b"], z_hc, z_hc], axis=1),
        jnp.concatenate([z_hc, z_hc, p1["w1g"], p1["w1b"]], axis=1),
    ], axis=0)
    b1_f = jnp.concatenate([p0["b1g"], p0["b1b"], p1["b1g"], p1["b1b"]], axis=1)

    # MLP layer 2: (4C, 4C) block-diagonal of [w2g0, w2b0, w2g1, w2b1]
    z_cc = jnp.zeros((C, C), jnp.float32)
    blocks2 = [p0["w2g"], p0["w2b"], p1["w2g"], p1["w2b"]]
    w2_f = jnp.concatenate(
        [jnp.concatenate([blk if j == i else z_cc for j in range(4)], axis=1)
         for i, blk in enumerate(blocks2)], axis=0)
    b2_f = jnp.concatenate([p0["b2g"], p0["b2b"], p1["b2g"], p1["b2b"]], axis=1)

    return dict(wih=wih_f, whh=whh_f, b=b_f, w1=w1_f, b1=b1_f, w2=w2_f, b2=b2_f)


def dfblk_rnn_forward(x_bchw, y, fused):
    """x: (B, C, H, W) f32, y: (seq, cond_dim) f32.  One fused pallas_call."""
    B, C, H, W = x_bchw.shape
    HW = H * W
    x_r = x_bchw.reshape(B * C, HW)                       # full-vreg apply tile
    vmem = pl.BlockSpec(memory_space=pltpu.MemorySpace.VMEM)
    out = pl.pallas_call(
        dfblk_kernel,
        out_shape=jax.ShapeDtypeStruct((B * C, HW), jnp.float32),
        in_specs=[vmem] * 9,
        out_specs=vmem,
    )(y, fused["wih"], fused["whh"], fused["b"],
      fused["w1"], fused["b1"], fused["w2"], fused["b2"], x_r)
    return out.reshape(B, C, H, W)


# -----------------------------------------------------------------------------
# Parameter init (mirrors PyTorch defaults + Affine_rnn._initialize), stored in
# the "transposed, concatenated-gate" layout used by the reference & fusion.
# -----------------------------------------------------------------------------
def init_affine_rnn_params(key, cond_dim, C, hidden, zero_last=True):
    ks = jax.random.split(key, 12)
    bound = 1.0 / (hidden ** 0.5)
    u = lambda k, shape: jax.random.uniform(k, shape, jnp.float32, -bound, bound)

    # nn.LSTM(cond_dim, hidden) default init; torch layout (4H, in), gates i,f,g,o
    weight_ih = u(ks[0], (4 * hidden, cond_dim))
    weight_hh = u(ks[1], (4 * hidden, hidden))
    bias_ih = u(ks[2], (4 * hidden,))
    bias_hh = u(ks[3], (4 * hidden,))
    # fc_gamma[0] / fc_beta[0] : Linear(hidden, C) default init
    w1g = u(ks[4], (C, hidden)); b1g = u(ks[5], (C,))
    w1b = u(ks[6], (C, hidden)); b1b = u(ks[7], (C,))
    if zero_last:
        # _initialize(): last Linear(C, C) -> weight=0, gamma bias=1, beta bias=0
        w2g = jnp.zeros((C, C), jnp.float32); b2g = jnp.ones((C,), jnp.float32)
        w2b = jnp.zeros((C, C), jnp.float32); b2b = jnp.zeros((C,), jnp.float32)
    else:
        # test-only: random last layers so the LSTM/MLP path is actually exercised
        w2g = u(ks[8], (C, C)); b2g = u(ks[9], (C,))
        w2b = u(ks[10], (C, C)); b2b = u(ks[11], (C,))

    return dict(
        wih=weight_ih.T,                               # (cond_dim, 4H)
        whh=weight_hh.T,                               # (hidden, 4H)
        b=(bias_ih + bias_hh).reshape(1, 4 * hidden),  # (1, 4H)
        w1g=w1g.T, b1g=b1g.reshape(1, C), w2g=w2g.T, b2g=b2g.reshape(1, C),
        w1b=w1b.T, b1b=b1b.reshape(1, C), w2b=w2b.T, b2b=b2b.reshape(1, C),
    )


# -----------------------------------------------------------------------------
# Pure-JAX reference (for correctness check), uses the un-fused per-head params.
# -----------------------------------------------------------------------------
def _ref_affine_params(y, p):
    hidden = p["whh"].shape[0]
    h = jnp.zeros((1, hidden), jnp.float32)
    c = jnp.zeros((1, hidden), jnp.float32)
    for t in range(y.shape[0]):
        gates = y[t:t + 1] @ p["wih"] + h @ p["whh"] + p["b"]
        i = jax.nn.sigmoid(gates[:, 0 * hidden:1 * hidden])
        f = jax.nn.sigmoid(gates[:, 1 * hidden:2 * hidden])
        g = jnp.tanh(gates[:, 2 * hidden:3 * hidden])
        o = jax.nn.sigmoid(gates[:, 3 * hidden:4 * hidden])
        c = f * c + i * g
        h = o * jnp.tanh(c)
    gamma = jnp.maximum(h @ p["w1g"] + p["b1g"], 0.0) @ p["w2g"] + p["b2g"]
    beta = jnp.maximum(h @ p["w1b"] + p["b1b"], 0.0) @ p["w2b"] + p["b2b"]
    return gamma, beta


def _ref_forward(x, y, p0, p1):
    lrelu = lambda v: jnp.where(v >= 0, v, 0.2 * v)
    aff = lambda x, g, b: g.reshape(1, -1, 1, 1) * x + b.reshape(1, -1, 1, 1)
    g0, b0 = _ref_affine_params(y, p0)
    g1, b1 = _ref_affine_params(y, p1)
    h = lrelu(aff(x, g0, b0))
    return lrelu(aff(h, g1, b1))


if __name__ == "__main__":
    B, C, H, W = 2, 4, 16, 16          # x: NCHW, in_ch = 4
    cond_dim, hidden, seq = 16, 32, 8  # DFBLK_rnn(cond_dim=16, in_ch=4, hidden_size=32)

    key = jax.random.PRNGKey(0)
    kx, ky, k0, k1, k2, k3 = jax.random.split(key, 6)
    x = jax.random.normal(kx, (B, C, H, W), jnp.float32)
    y = jax.random.normal(ky, (seq, cond_dim), jnp.float32)  # torch: y.unsqueeze(0) -> batch 1

    # 1) faithful module init (last affine layers zero/one as in _initialize())
    p0 = init_affine_rnn_params(k0, cond_dim, C, hidden, zero_last=True)
    p1 = init_affine_rnn_params(k1, cond_dim, C, hidden, zero_last=True)
    fused = prepare_fused_params(p0, p1, C, hidden)        # packed ONCE, not per call
    out = jax.block_until_ready(dfblk_rnn_forward(x, y, fused))
    ref = _ref_forward(x, y, p0, p1)
    assert out.shape == (B, C, H, W)
    assert jnp.allclose(out, ref, rtol=1e-3, atol=1e-3), float(jnp.max(jnp.abs(out - ref)))

    # 2) randomized last layers so the full LSTM + MLP path is exercised
    q0 = init_affine_rnn_params(k2, cond_dim, C, hidden, zero_last=False)
    q1 = init_affine_rnn_params(k3, cond_dim, C, hidden, zero_last=False)
    qfused = prepare_fused_params(q0, q1, C, hidden)
    out2 = jax.block_until_ready(dfblk_rnn_forward(x, y, qfused))
    ref2 = _ref_forward(x, y, q0, q1)
    assert jnp.allclose(out2, ref2, rtol=1e-3, atol=1e-3), float(jnp.max(jnp.abs(out2 - ref2)))

    print("KERNEL_OK")
</pallas_src>

<mosaic_0001>
module attributes {stable_mosaic.version = 11 : i64} {
  func.func @dfblk_kernel(%arg0: memref<8x16xf32, #tpu.memory_space<vmem>>, %arg1: memref<16x256xf32, #tpu.memory_space<vmem>>, %arg2: memref<64x256xf32, #tpu.memory_space<vmem>>, %arg3: memref<1x256xf32, #tpu.memory_space<vmem>>, %arg4: memref<64x16xf32, #tpu.memory_space<vmem>>, %arg5: memref<1x16xf32, #tpu.memory_space<vmem>>, %arg6: memref<16x16xf32, #tpu.memory_space<vmem>>, %arg7: memref<1x16xf32, #tpu.memory_space<vmem>>, %arg8: memref<8x256xf32, #tpu.memory_space<vmem>>, %arg9: memref<8x256xf32, #tpu.memory_space<vmem>>) attributes {dimension_semantics = [], scalar_prefetch = 0 : i64, scratch_operands = 0 : i64, tpu.core_type = #tpu.core_type<tc>} {
    %c0 = arith.constant 0 : index
    %c0_0 = arith.constant 0 : index
    %0 = vector.load %arg0[%c0, %c0_0] : memref<8x16xf32, #tpu.memory_space<vmem>>, vector<8x16xf32>
    %c0_1 = arith.constant 0 : index
    %c0_2 = arith.constant 0 : index
    %1 = vector.load %arg1[%c0_1, %c0_2] : memref<16x256xf32, #tpu.memory_space<vmem>>, vector<16x256xf32>
    %cst = arith.constant dense<0.000000e+00> : vector<8x256xf32>
    %2 = tpu.matmul %0, %1, %cst {dimension_numbers = #tpu.dot_dimension_numbers<[1], [0], [0], [1], [0, 0, 1, 1], [], []>} : vector<8x16xf32>, vector<16x256xf32>, vector<8x256xf32> -> vector<8x256xf32>
    %c0_3 = arith.constant 0 : index
    %c0_4 = arith.constant 0 : index
    %3 = vector.load %arg3[%c0_3, %c0_4] : memref<1x256xf32, #tpu.memory_space<vmem>>, vector<1x256xf32>
    %4 = vector.broadcast %3 : vector<1x256xf32> to vector<8x256xf32>
    %5 = arith.addf %2, %4 : vector<8x256xf32>
    %c0_5 = arith.constant 0 : index
    %c0_6 = arith.constant 0 : index
    %6 = vector.load %arg2[%c0_5, %c0_6] : memref<64x256xf32, #tpu.memory_space<vmem>>, vector<64x256xf32>
    %cst_7 = arith.constant 0.000000e+00 : f32
    %7 = vector.broadcast %cst_7 : f32 to vector<1x64xf32>
    %cst_8 = arith.constant 0.000000e+00 : f32
    %8 = vector.broadcast %cst_8 : f32 to vector<1x64xf32>
    %cst_9 = arith.constant dense<0.000000e+00> : vector<1x256xf32>
    %9 = tpu.matmul %7, %6, %cst_9 {dimension_numbers = #tpu.dot_dimension_numbers<[1], [0], [0], [1], [0, 0, 1, 1], [], []>} : vector<1x64xf32>, vector<64x256xf32>, vector<1x256xf32> -> vector<1x256xf32>
    %10 = vector.extract_strided_slice %5 {offsets = [0, 0], sizes = [1, 256], strides = [1, 1]} : vector<8x256xf32> to vector<1x256xf32>
    %11 = arith.addf %9, %10 : vector<1x256xf32>
    %12 = vector.extract_strided_slice %11 {offsets = [0, 0], sizes = [1, 192], strides = [1, 1]} : vector<1x256xf32> to vector<1x192xf32>
    %13 = arith.negf %12 : vector<1x192xf32>
    %14 = math.exp %13 : vector<1x192xf32>
    %cst_10 = arith.constant 1.000000e+00 : f32
    %15 = vector.broadcast %cst_10 : f32 to vector<1x192xf32>
    %16 = arith.addf %15, %14 : vector<1x192xf32>
    %17 = arith.divf %15, %16 : vector<1x192xf32>
    %18 = vector.extract_strided_slice %11 {offsets = [0, 192], sizes = [1, 64], strides = [1, 1]} : vector<1x256xf32> to vector<1x64xf32>
    %19 = math.tanh %18 : vector<1x64xf32>
    %20 = vector.extract_strided_slice %17 {offsets = [0, 0], sizes = [1, 64], strides = [1, 1]} : vector<1x192xf32> to vector<1x64xf32>
    %21 = vector.extract_strided_slice %17 {offsets = [0, 64], sizes = [1, 64], strides = [1, 1]} : vector<1x192xf32> to vector<1x64xf32>
    %22 = vector.extract_strided_slice %17 {offsets = [0, 128], sizes = [1, 64], strides = [1, 1]} : vector<1x192xf32> to vector<1x64xf32>
    %23 = arith.mulf %21, %8 : vector<1x64xf32>
    %24 = arith.mulf %20, %19 : vector<1x64xf32>
    %25 = arith.addf %23, %24 : vector<1x64xf32>
    %26 = math.tanh %25 : vector<1x64xf32>
    %27 = arith.mulf %22, %26 : vector<1x64xf32>
    %cst_11 = arith.constant dense<0.000000e+00> : vector<1x256xf32>
    %28 = tpu.matmul %27, %6, %cst_11 {dimension_numbers = #tpu.dot_dimension_numbers<[1], [0], [0], [1], [0, 0, 1, 1], [], []>} : vector<1x64xf32>, vector<64x256xf32>, vector<1x256xf32> -> vector<1x256xf32>
    %29 = vector.extract_strided_slice %5 {offsets = [1, 0], sizes = [1, 256], strides = [1, 1]} : vector<8x256xf32> to vector<1x256xf32>
    %30 = arith.addf %28, %29 : vector<1x256xf32>
    %31 = vector.extract_strided_slice %30 {offsets = [0, 0], sizes = [1, 192], strides = [1, 1]} : vector<1x256xf32> to vector<1x192xf32>
    %32 = arith.negf %31 : vector<1x192xf32>
    %33 = math.exp %32 : vector<1x192xf32>
    %cst_12 = arith.constant 1.000000e+00 : f32
    %34 = vector.broadcast %cst_12 : f32 to vector<1x192xf32>
    %35 = arith.addf %34, %33 : vector<1x192xf32>
    %36 = arith.divf %34, %35 : vector<1x192xf32>
    %37 = vector.extract_strided_slice %30 {offsets = [0, 192], sizes = [1, 64], strides = [1, 1]} : vector<1x256xf32> to vector<1x64xf32>
    %38 = math.tanh %37 : vector<1x64xf32>
    %39 = vector.extract_strided_slice %36 {offsets = [0, 0], sizes = [1, 64], strides = [1, 1]} : vector<1x192xf32> to vector<1x64xf32>
    %40 = vector.extract_strided_slice %36 {offsets = [0, 64], sizes = [1, 64], strides = [1, 1]} : vector<1x192xf32> to vector<1x64xf32>
    %41 = vector.extract_strided_slice %36 {offsets = [0, 128], sizes = [1, 64], strides = [1, 1]} : vector<1x192xf32> to vector<1x64xf32>
    %42 = arith.mulf %40, %25 : vector<1x64xf32>
    %43 = arith.mulf %39, %38 : vector<1x64xf32>
    %44 = arith.addf %42, %43 : vector<1x64xf32>
    %45 = math.tanh %44 : vector<1x64xf32>
    %46 = arith.mulf %41, %45 : vector<1x64xf32>
    %cst_13 = arith.constant dense<0.000000e+00> : vector<1x256xf32>
    %47 = tpu.matmul %46, %6, %cst_13 {dimension_numbers = #tpu.dot_dimension_numbers<[1], [0], [0], [1], [0, 0, 1, 1], [], []>} : vector<1x64xf32>, vector<64x256xf32>, vector<1x256xf32> -> vector<1x256xf32>
    %48 = vector.extract_strided_slice %5 {offsets = [2, 0], sizes = [1, 256], strides = [1, 1]} : vector<8x256xf32> to vector<1x256xf32>
    %49 = arith.addf %47, %48 : vector<1x256xf32>
    %50 = vector.extract_strided_slice %49 {offsets = [0, 0], sizes = [1, 192], strides = [1, 1]} : vector<1x256xf32> to vector<1x192xf32>
    %51 = arith.negf %50 : vector<1x192xf32>
    %52 = math.exp %51 : vector<1x192xf32>
    %cst_14 = arith.constant 1.000000e+00 : f32
    %53 = vector.broadcast %cst_14 : f32 to vector<1x192xf32>
    %54 = arith.addf %53, %52 : vector<1x192xf32>
    %55 = arith.divf %53, %54 : vector<1x192xf32>
    %56 = vector.extract_strided_slice %49 {offsets = [0, 192], sizes = [1, 64], strides = [1, 1]} : vector<1x256xf32> to vector<1x64xf32>
    %57 = math.tanh %56 : vector<1x64xf32>
    %58 = vector.extract_strided_slice %55 {offsets = [0, 0], sizes = [1, 64], strides = [1, 1]} : vector<1x192xf32> to vector<1x64xf32>
    %59 = vector.extract_strided_slice %55 {offsets = [0, 64], sizes = [1, 64], strides = [1, 1]} : vector<1x192xf32> to vector<1x64xf32>
    %60 = vector.extract_strided_slice %55 {offsets = [0, 128], sizes = [1, 64], strides = [1, 1]} : vector<1x192xf32> to vector<1x64xf32>
    %61 = arith.mulf %59, %44 : vector<1x64xf32>
    %62 = arith.mulf %58, %57 : vector<1x64xf32>
    %63 = arith.addf %61, %62 : vector<1x64xf32>
    %64 = math.tanh %63 : vector<1x64xf32>
    %65 = arith.mulf %60, %64 : vector<1x64xf32>
    %cst_15 = arith.constant dense<0.000000e+00> : vector<1x256xf32>
    %66 = tpu.matmul %65, %6, %cst_15 {dimension_numbers = #tpu.dot_dimension_numbers<[1], [0], [0], [1], [0, 0, 1, 1], [], []>} : vector<1x64xf32>, vector<64x256xf32>, vector<1x256xf32> -> vector<1x256xf32>
    %67 = vector.extract_strided_slice %5 {offsets = [3, 0], sizes = [1, 256], strides = [1, 1]} : vector<8x256xf32> to vector<1x256xf32>
    %68 = arith.addf %66, %67 : vector<1x256xf32>
    %69 = vector.extract_strided_slice %68 {offsets = [0, 0], sizes = [1, 192], strides = [1, 1]} : vector<1x256xf32> to vector<1x192xf32>
    %70 = arith.negf %69 : vector<1x192xf32>
    %71 = math.exp %70 : vector<1x192xf32>
    %cst_16 = arith.constant 1.000000e+00 : f32
    %72 = vector.broadcast %cst_16 : f32 to vector<1x192xf32>
    %73 = arith.addf %72, %71 : vector<1x192xf32>
    %74 = arith.divf %72, %73 : vector<1x192xf32>
    %75 = vector.extract_strided_slice %68 {offsets = [0, 192], sizes = [1, 64], strides = [1, 1]} : vector<1x256xf32> to vector<1x64xf32>
    %76 = math.tanh %75 : vector<1x64xf32>
    %77 = vector.extract_strided_slice %74 {offsets = [0, 0], sizes = [1, 64], strides = [1, 1]} : vector<1x192xf32> to vector<1x64xf32>
    %78 = vector.extract_strided_slice %74 {offsets = [0, 64], sizes = [1, 64], strides = [1, 1]} : vector<1x192xf32> to vector<1x64xf32>
    %79 = vector.extract_strided_slice %74 {offsets = [0, 128], sizes = [1, 64], strides = [1, 1]} : vector<1x192xf32> to vector<1x64xf32>
    %80 = arith.mulf %78, %63 : vector<1x64xf32>
    %81 = arith.mulf %77, %76 : vector<1x64xf32>
    %82 = arith.addf %80, %81 : vector<1x64xf32>
    %83 = math.tanh %82 : vector<1x64xf32>
    %84 = arith.mulf %79, %83 : vector<1x64xf32>
    %cst_17 = arith.constant dense<0.000000e+00> : vector<1x256xf32>
    %85 = tpu.matmul %84, %6, %cst_17 {dimension_numbers = #tpu.dot_dimension_numbers<[1], [0], [0], [1], [0, 0, 1, 1], [], []>} : vector<1x64xf32>, vector<64x256xf32>, vector<1x256xf32> -> vector<1x256xf32>
    %86 = vector.extract_strided_slice %5 {offsets = [4, 0], sizes = [1, 256], strides = [1, 1]} : vector<8x256xf32> to vector<1x256xf32>
    %87 = arith.addf %85, %86 : vector<1x256xf32>
    %88 = vector.extract_strided_slice %87 {offsets = [0, 0], sizes = [1, 192], strides = [1, 1]} : vector<1x256xf32> to vector<1x192xf32>
    %89 = arith.negf %88 : vector<1x192xf32>
    %90 = math.exp %89 : vector<1x192xf32>
    %cst_18 = arith.constant 1.000000e+00 : f32
    %91 = vector.broadcast %cst_18 : f32 to vector<1x192xf32>
    %92 = arith.addf %91, %90 : vector<1x192xf32>
    %93 = arith.divf %91, %92 : vector<1x192xf32>
    %94 = vector.extract_strided_slice %87 {offsets = [0, 192], sizes = [1, 64], strides = [1, 1]} : vector<1x256xf32> to vector<1x64xf32>
    %95 = math.tanh %94 : vector<1x64xf32>
    %96 = vector.extract_strided_slice %93 {offsets = [0, 0], sizes = [1, 64], strides = [1, 1]} : vector<1x192xf32> to vector<1x64xf32>
    %97 = vector.extract_strided_slice %93 {offsets = [0, 64], sizes = [1, 64], strides = [1, 1]} : vector<1x192xf32> to vector<1x64xf32>
    %98 = vector.extract_strided_slice %93 {offsets = [0, 128], sizes = [1, 64], strides = [1, 1]} : vector<1x192xf32> to vector<1x64xf32>
    %99 = arith.mulf %97, %82 : vector<1x64xf32>
    %100 = arith.mulf %96, %95 : vector<1x64xf32>
    %101 = arith.addf %99, %100 : vector<1x64xf32>
    %102 = math.tanh %101 : vector<1x64xf32>
    %103 = arith.mulf %98, %102 : vector<1x64xf32>
    %cst_19 = arith.constant dense<0.000000e+00> : vector<1x256xf32>
    %104 = tpu.matmul %103, %6, %cst_19 {dimension_numbers = #tpu.dot_dimension_numbers<[1], [0], [0], [1], [0, 0, 1, 1], [], []>} : vector<1x64xf32>, vector<64x256xf32>, vector<1x256xf32> -> vector<1x256xf32>
    %105 = vector.extract_strided_slice %5 {offsets = [5, 0], sizes = [1, 256], strides = [1, 1]} : vector<8x256xf32> to vector<1x256xf32>
    %106 = arith.addf %104, %105 : vector<1x256xf32>
    %107 = vector.extract_strided_slice %106 {offsets = [0, 0], sizes = [1, 192], strides = [1, 1]} : vector<1x256xf32> to vector<1x192xf32>
    %108 = arith.negf %107 : vector<1x192xf32>
    %109 = math.exp %108 : vector<1x192xf32>
    %cst_20 = arith.constant 1.000000e+00 : f32
    %110 = vector.broadcast %cst_20 : f32 to vector<1x192xf32>
    %111 = arith.addf %110, %109 : vector<1x192xf32>
    %112 = arith.divf %110, %111 : vector<1x192xf32>
    %113 = vector.extract_strided_slice %106 {offsets = [0, 192], sizes = [1, 64], strides = [1, 1]} : vector<1x256xf32> to vector<1x64xf32>
    %114 = math.tanh %113 : vector<1x64xf32>
    %115 = vector.extract_strided_slice %112 {offsets = [0, 0], sizes = [1, 64], strides = [1, 1]} : vector<1x192xf32> to vector<1x64xf32>
    %116 = vector.extract_strided_slice %112 {offsets = [0, 64], sizes = [1, 64], strides = [1, 1]} : vector<1x192xf32> to vector<1x64xf32>
    %117 = vector.extract_strided_slice %112 {offsets = [0, 128], sizes = [1, 64], strides = [1, 1]} : vector<1x192xf32> to vector<1x64xf32>
    %118 = arith.mulf %116, %101 : vector<1x64xf32>
    %119 = arith.mulf %115, %114 : vector<1x64xf32>
    %120 = arith.addf %118, %119 : vector<1x64xf32>
    %121 = math.tanh %120 : vector<1x64xf32>
    %122 = arith.mulf %117, %121 : vector<1x64xf32>
    %cst_21 = arith.constant dense<0.000000e+00> : vector<1x256xf32>
    %123 = tpu.matmul %122, %6, %cst_21 {dimension_numbers = #tpu.dot_dimension_numbers<[1], [0], [0], [1], [0, 0, 1, 1], [], []>} : vector<1x64xf32>, vector<64x256xf32>, vector<1x256xf32> -> vector<1x256xf32>
    %124 = vector.extract_strided_slice %5 {offsets = [6, 0], sizes = [1, 256], strides = [1, 1]} : vector<8x256xf32> to vector<1x256xf32>
    %125 = arith.addf %123, %124 : vector<1x256xf32>
    %126 = vector.extract_strided_slice %125 {offsets = [0, 0], sizes = [1, 192], strides = [1, 1]} : vector<1x256xf32> to vector<1x192xf32>
    %127 = arith.negf %126 : vector<1x192xf32>
    %128 = math.exp %127 : vector<1x192xf32>
    %cst_22 = arith.constant 1.000000e+00 : f32
    %129 = vector.broadcast %cst_22 : f32 to vector<1x192xf32>
    %130 = arith.addf %129, %128 : vector<1x192xf32>
    %131 = arith.divf %129, %130 : vector<1x192xf32>
    %132 = vector.extract_strided_slice %125 {offsets = [0, 192], sizes = [1, 64], strides = [1, 1]} : vector<1x256xf32> to vector<1x64xf32>
    %133 = math.tanh %132 : vector<1x64xf32>
    %134 = vector.extract_strided_slice %131 {offsets = [0, 0], sizes = [1, 64], strides = [1, 1]} : vector<1x192xf32> to vector<1x64xf32>
    %135 = vector.extract_strided_slice %131 {offsets = [0, 64], sizes = [1, 64], strides = [1, 1]} : vector<1x192xf32> to vector<1x64xf32>
    %136 = vector.extract_strided_slice %131 {offsets = [0, 128], sizes = [1, 64], strides = [1, 1]} : vector<1x192xf32> to vector<1x64xf32>
    %137 = arith.mulf %135, %120 : vector<1x64xf32>
    %138 = arith.mulf %134, %133 : vector<1x64xf32>
    %139 = arith.addf %137, %138 : vector<1x64xf32>
    %140 = math.tanh %139 : vector<1x64xf32>
    %141 = arith.mulf %136, %140 : vector<1x64xf32>
    %cst_23 = arith.constant dense<0.000000e+00> : vector<1x256xf32>
    %142 = tpu.matmul %141, %6, %cst_23 {dimension_numbers = #tpu.dot_dimension_numbers<[1], [0], [0], [1], [0, 0, 1, 1], [], []>} : vector<1x64xf32>, vector<64x256xf32>, vector<1x256xf32> -> vector<1x256xf32>
    %143 = vector.extract_strided_slice %5 {offsets = [7, 0], sizes = [1, 256], strides = [1, 1]} : vector<8x256xf32> to vector<1x256xf32>
    %144 = arith.addf %142, %143 : vector<1x256xf32>
    %145 = vector.extract_strided_slice %144 {offsets = [0, 0], sizes = [1, 192], strides = [1, 1]} : vector<1x256xf32> to vector<1x192xf32>
    %146 = arith.negf %145 : vector<1x192xf32>
    %147 = math.exp %146 : vector<1x192xf32>
    %cst_24 = arith.constant 1.000000e+00 : f32
    %148 = vector.broadcast %cst_24 : f32 to vector<1x192xf32>
    %149 = arith.addf %148, %147 : vector<1x192xf32>
    %150 = arith.divf %148, %149 : vector<1x192xf32>
    %151 = vector.extract_strided_slice %144 {offsets = [0, 192], sizes = [1, 64], strides = [1, 1]} : vector<1x256xf32> to vector<1x64xf32>
    %152 = math.tanh %151 : vector<1x64xf32>
    %153 = vector.extract_strided_slice %150 {offsets = [0, 0], sizes = [1, 64], strides = [1, 1]} : vector<1x192xf32> to vector<1x64xf32>
    %154 = vector.extract_strided_slice %150 {offsets = [0, 64], sizes = [1, 64], strides = [1, 1]} : vector<1x192xf32> to vector<1x64xf32>
    %155 = vector.extract_strided_slice %150 {offsets = [0, 128], sizes = [1, 64], strides = [1, 1]} : vector<1x192xf32> to vector<1x64xf32>
    %156 = arith.mulf %154, %139 : vector<1x64xf32>
    %157 = arith.mulf %153, %152 : vector<1x64xf32>
    %158 = arith.addf %156, %157 : vector<1x64xf32>
    %159 = math.tanh %158 : vector<1x64xf32>
    %160 = arith.mulf %155, %159 : vector<1x64xf32>
    %c0_25 = arith.constant 0 : index
    %c0_26 = arith.constant 0 : index
    %161 = vector.load %arg4[%c0_25, %c0_26] : memref<64x16xf32, #tpu.memory_space<vmem>>, vector<64x16xf32>
    %cst_27 = arith.constant dense<0.000000e+00> : vector<1x16xf32>
    %162 = tpu.matmul %160, %161, %cst_27 {dimension_numbers = #tpu.dot_dimension_numbers<[1], [0], [0], [1], [0, 0, 1, 1], [], []>} : vector<1x64xf32>, vector<64x16xf32>, vector<1x16xf32> -> vector<1x16xf32>
    %c0_28 = arith.constant 0 : index
    %c0_29 = arith.constant 0 : index
    %163 = vector.load %arg5[%c0_28, %c0_29] : memref<1x16xf32, #tpu.memory_space<vmem>>, vector<1x16xf32>
    %164 = arith.addf %162, %163 : vector<1x16xf32>
    %cst_30 = arith.constant 0.000000e+00 : f32
    %165 = vector.broadcast %cst_30 : f32 to vector<1x16xf32>
    %166 = arith.maximumf %164, %165 : vector<1x16xf32>
    %c0_31 = arith.constant 0 : index
    %c0_32 = arith.constant 0 : index
    %167 = vector.load %arg6[%c0_31, %c0_32] : memref<16x16xf32, #tpu.memory_space<vmem>>, vector<16x16xf32>
    %cst_33 = arith.constant dense<0.000000e+00> : vector<1x16xf32>
    %168 = tpu.matmul %166, %167, %cst_33 {dimension_numbers = #tpu.dot_dimension_numbers<[1], [0], [0], [1], [0, 0, 1, 1], [], []>} : vector<1x16xf32>, vector<16x16xf32>, vector<1x16xf32> -> vector<1x16xf32>
    %c0_34 = arith.constant 0 : index
    %c0_35 = arith.constant 0 : index
    %169 = vector.load %arg7[%c0_34, %c0_35] : memref<1x16xf32, #tpu.memory_space<vmem>>, vector<1x16xf32>
    %170 = arith.addf %168, %169 : vector<1x16xf32>
    %171 = tpu.iota {dimensions = array<i32: 0>} : vector<8x16xi32>
    %172 = tpu.iota {dimensions = array<i32: 1>} : vector<8x16xi32>
    %c4_i32 = arith.constant 4 : i32
    %c0_i32 = arith.constant 0 : i32
    %173 = arith.cmpi eq, %c4_i32, %c0_i32 : i32
    %c1_i32 = arith.constant 1 : i32
    %174 = arith.select %173, %c1_i32, %c4_i32 : i32
    %175 = vector.broadcast %174 : i32 to vector<8x16xi32>
    %176 = arith.remsi %171, %175 : vector<8x16xi32>
    %c0_i32_36 = arith.constant 0 : i32
    %177 = vector.broadcast %c0_i32_36 : i32 to vector<8x16xi32>
    %178 = arith.cmpi ne, %176, %177 : vector<8x16xi32>
    %c0_i32_37 = arith.constant 0 : i32
    %179 = vector.broadcast %c0_i32_37 : i32 to vector<8x16xi32>
    %180 = arith.cmpi slt, %176, %179 : vector<8x16xi32>
    %c0_i32_38 = arith.constant 0 : i32
    %181 = arith.cmpi slt, %174, %c0_i32_38 : i32
    %182 = vector.broadcast %181 : i1 to vector<8x16xi1>
    %183 = vector.broadcast %182 : vector<8x16xi1> to vector<8x16xi1>
    %184 = arith.xori %180, %183 : vector<8x16xi1>
    %185 = arith.andi %184, %178 : vector<8x16xi1>
    %186 = vector.broadcast %174 : i32 to vector<8x16xi32>
    %187 = arith.addi %176, %186 : vector<8x16xi32>
    %188 = arith.select %185, %187, %176 : vector<8x16xi1>, vector<8x16xi32>
    %189 = vector.shape_cast %170 : vector<1x16xf32> to vector<1x16xf32>
    %190 = vector.broadcast %189 : vector<1x16xf32> to vector<8x16xf32>
    %c0_i32_39 = arith.constant 0 : i32
    %191 = vector.broadcast %c0_i32_39 : i32 to vector<8x16xi32>
    %192 = arith.addi %188, %191 : vector<8x16xi32>
    %193 = arith.cmpi eq, %172, %192 : vector<8x16xi32>
    %cst_40 = arith.constant 0.000000e+00 : f32
    %194 = vector.broadcast %cst_40 : f32 to vector<8x16xf32>
    %195 = arith.select %193, %190, %194 : vector<8x16xi1>, vector<8x16xf32>
    %cst_41 = arith.constant dense<0.000000e+00> : vector<8xf32>
    %196 = vector.multi_reduction <add>, %195, %cst_41 [1] : vector<8x16xf32> to vector<8xf32>
    %197 = vector.shape_cast %196 : vector<8xf32> to vector<8x1xf32>
    %c4_i32_42 = arith.constant 4 : i32
    %198 = vector.broadcast %c4_i32_42 : i32 to vector<8x16xi32>
    %199 = arith.addi %188, %198 : vector<8x16xi32>
    %200 = arith.cmpi eq, %172, %199 : vector<8x16xi32>
    %cst_43 = arith.constant 0.000000e+00 : f32
    %201 = vector.broadcast %cst_43 : f32 to vector<8x16xf32>
    %202 = arith.select %200, %190, %201 : vector<8x16xi1>, vector<8x16xf32>
    %cst_44 = arith.constant dense<0.000000e+00> : vector<8xf32>
    %203 = vector.multi_reduction <add>, %202, %cst_44 [1] : vector<8x16xf32> to vector<8xf32>
    %204 = vector.shape_cast %203 : vector<8xf32> to vector<8x1xf32>
    %c8_i32 = arith.constant 8 : i32
    %205 = vector.broadcast %c8_i32 : i32 to vector<8x16xi32>
    %206 = arith.addi %188, %205 : vector<8x16xi32>
    %207 = arith.cmpi eq, %172, %206 : vector<8x16xi32>
    %cst_45 = arith.constant 0.000000e+00 : f32
    %208 = vector.broadcast %cst_45 : f32 to vector<8x16xf32>
    %209 = arith.select %207, %190, %208 : vector<8x16xi1>, vector<8x16xf32>
    %cst_46 = arith.constant dense<0.000000e+00> : vector<8xf32>
    %210 = vector.multi_reduction <add>, %209, %cst_46 [1] : vector<8x16xf32> to vector<8xf32>
    %211 = vector.shape_cast %210 : vector<8xf32> to vector<8x1xf32>
    %c12_i32 = arith.constant 12 : i32
    %212 = vector.broadcast %c12_i32 : i32 to vector<8x16xi32>
    %213 = arith.addi %188, %212 : vector<8x16xi32>
    %214 = arith.cmpi eq, %172, %213 : vector<8x16xi32>
    %cst_47 = arith.constant 0.000000e+00 : f32
    %215 = vector.broadcast %cst_47 : f32 to vector<8x16xf32>
    %216 = arith.select %214, %190, %215 : vector<8x16xi1>, vector<8x16xf32>
    %cst_48 = arith.constant dense<0.000000e+00> : vector<8xf32>
    %217 = vector.multi_reduction <add>, %216, %cst_48 [1] : vector<8x16xf32> to vector<8xf32>
    %218 = vector.shape_cast %217 : vector<8xf32> to vector<8x1xf32>
    %c0_49 = arith.constant 0 : index
    %c0_50 = arith.constant 0 : index
    %219 = vector.load %arg8[%c0_49, %c0_50] : memref<8x256xf32, #tpu.memory_space<vmem>>, vector<8x256xf32>
    %220 = vector.broadcast %197 : vector<8x1xf32> to vector<8x256xf32>
    %221 = arith.mulf %220, %219 : vector<8x256xf32>
    %222 = vector.broadcast %204 : vector<8x1xf32> to vector<8x256xf32>
    %223 = arith.addf %221, %222 : vector<8x256xf32>
    %cst_51 = arith.constant 0.000000e+00 : f32
    %224 = vector.broadcast %cst_51 : f32 to vector<8x256xf32>
    %225 = arith.cmpf oge, %223, %224 : vector<8x256xf32>
    %cst_52 = arith.constant 2.000000e-01 : f32
    %226 = vector.broadcast %cst_52 : f32 to vector<8x256xf32>
    %227 = arith.mulf %226, %223 : vector<8x256xf32>
    %228 = arith.select %225, %223, %227 : vector<8x256xi1>, vector<8x256xf32>
    %229 = vector.broadcast %211 : vector<8x1xf32> to vector<8x256xf32>
    %230 = arith.mulf %229, %228 : vector<8x256xf32>
    %231 = vector.broadcast %218 : vector<8x1xf32> to vector<8x256xf32>
    %232 = arith.addf %230, %231 : vector<8x256xf32>
    %cst_53 = arith.constant 0.000000e+00 : f32
    %233 = vector.broadcast %cst_53 : f32 to vector<8x256xf32>
    %234 = arith.cmpf oge, %232, %233 : vector<8x256xf32>
    %cst_54 = arith.constant 2.000000e-01 : f32
    %235 = vector.broadcast %cst_54 : f32 to vector<8x256xf32>
    %236 = arith.mulf %235, %232 : vector<8x256xf32>
    %237 = arith.select %234, %232, %236 : vector<8x256xi1>, vector<8x256xf32>
    %c0_55 = arith.constant 0 : index
    %c0_56 = arith.constant 0 : index
    %238 = vector.load %arg9[%c0_55, %c0_56] : memref<8x256xf32, #tpu.memory_space<vmem>>, vector<8x256xf32>
    tpu.vector_store %arg9[%c0_55, %c0_56], %237 {strides = array<i32>} : memref<8x256xf32, #tpu.memory_space<vmem>>, vector<8x256xf32>,
    return
  }
}

</mosaic_0001>

<bundles_post_ra>
// kernel: tpu_custom_call.1
= control target key start
LH: loop header
LB: loop body
LE: loop exit
PB: predicated region body
PF: predicated region fallthrough
CT: control target
= control target key end

     0   :  { %14 = vsyncpa [#allocation3], 0  ;;  %s1635_s0 = inlined_call_operand.vmem [shape: f32[8,16], index: 0, kind: input, shape index: {}]   ;;  %s1636_s1 = inlined_call_operand.vmem [shape: f32[16,256], index: 1, kind: input, shape index: {}]   ;;  %s1637_s2 = inlined_call_operand.hbm [shape: f32[64,256], index: 2, kind: input, shape index: {}]   ;;  %s1638_s3 = inlined_call_operand.vmem [shape: f32[1,256], index: 3, kind: input, shape index: {}]   ;;  %s1639_s4 = inlined_call_operand.vmem [shape: f32[64,16], index: 4, kind: input, shape index: {}]   ;;  %s1640_s5 = inlined_call_operand.vmem [shape: f32[1,16], index: 5, kind: input, shape index: {}]   ;;  %s1641_s6 = inlined_call_operand.vmem [shape: f32[16,16], index: 6, kind: input, shape index: {}]   ;;  %s1642_s7 = inlined_call_operand.vmem [shape: f32[1,16], index: 7, kind: input, shape index: {}]   ;;  %s1643_s8 = inlined_call_operand.vmem [shape: f32[8,256], index: 8, kind: input, shape index: {}]   ;;  %s1644_s9 = inlined_call_operand.hbm [shape: f32[8,256], index: 9, kind: output, shape index: {}]  }
   0x1   :  { %15 = vsyncpa [#allocation4], 0  ;;  %s24_s11 = sshll.u32 %s1637_s2, 4  ;;  %s1271_s12 = smov [#allocation2]   ;;  %s25_s11 = int_to_ptr.hbm [resolvable:$true] %s24_s11 }
   0x2   :  { %s26_s13 = sshll.u32 %s1271_s12, 4  ;;  %s1272_s14 = smov 256   ;;  %s27_s13 = int_to_ptr.vmem [resolvable:$true] %s26_s13 }
   0x3   :  { %s1273_s15 = smov 16  }
   0x4   :  { %32 = dma.hbm_to_vmem [thread:$0]  %s25_s11, 2048, %s27_s13, [#allocation3], %s1272_s14, %s1272_s14, %s1273_s15  }
   0x5   :  { %1267 = dma.done.wait [#allocation3], 2048  }
   0x6   :  { %1268 = vsyncadd [#allocation3], 4294965248  ;;  %v1330_v0 = vld [vmem:[#allocation2 + $0x78] sm:$0xff]  ;;  %v1332_v1 = vld [vmem:[#allocation2 + $0x68] sm:$0xff]  ;;  %vm60_vm0 = vcmask 130048   ;;  %v1274_v21 = vmov 0.0  }
   0x7   :  { %152 = vmatpush.msra.mxu3 %v1330_v0  ;;  %v1335_v2 = vld [vmem:[#allocation2 + $0x58] sm:$0xff]  ;;  %v51_v4 = vld [vmem:[%s1636_s1 + $0x8] sm:$0xff]  ;;  %v49_v5 = vld [vmem:[%s1635_s0] sm:$0xff]  ;;  %s1275_s25 = smov 64   ;;  %vm120_vm9 = vcmask 523264   ;;  %s1073_s27 = sshll.u32 %s1644_s9, 4  ;;  %s1074_s27 = int_to_ptr.hbm [resolvable:$true] %s1073_s27 }
   0x8   :  { %v53_v3 = vld [vmem:[%s1636_s1 + $0x18] sm:$0xff]  ;;  %v1347_v6 = vld [vmem:[#allocation2 + $0x70] sm:$0xff]  ;;  %v1349_v7 = vld [vmem:[#allocation2 + $0x48] sm:$0xff] }
   0x9   :  { %153 = vmatpush.msra.mxu3 %v1332_v1  ;;  %98 = vmatpush.msra.mxu1 %v53_v3  ;;  %v1352_v8 = vld [vmem:[#allocation2 + $0x60] sm:$0xff]  ;;  %v1355_v9 = vld [vmem:[#allocation2 + $0x50] sm:$0xff]  ;;  %v1357_v10 = vld [vmem:[#allocation2 + $0x38] sm:$0xff] }
   0xa   :  { %132 = vmatpush.msra.mxu2 %v1347_v6  ;;  %v52_v11 = vld [vmem:[%s1636_s1 + $0x10] sm:$0xff]  ;;  %v50_v12 = vld [vmem:[%s1636_s1] sm:$0xff]  ;;  %v1370_v14 = vld [vmem:[#allocation2 + $0x28] sm:$0xff] }
   0xb   :  { %154 = vmatpush.msra.mxu3 %v1335_v2  ;;  %99 = vmatpush.msra.mxu1 %v51_v4  ;;  %v1368_v13 = vld [vmem:[#allocation2 + $0x40] sm:$0xff]  ;;  %v1375_v15 = vld [vmem:[#allocation2 + $0x30] sm:$0xff]  ;;  %v1377_v16 = vld [vmem:[#allocation2 + $0x18] sm:$0xff] }
   0xc   :  { %1084 = vmatmul.msk.f32.vlgmr.msra.gmra.mxu1 %vm60_vm0, %v49_v5  ;;  %133 = vmatpush.msra.mxu2 %v1352_v8  ;;  %v1382_v17 = vld [vmem:[#allocation2 + $0x20] sm:$0xff]  ;;  %v1385_v18 = vld [vmem:[#allocation2 + $0x8] sm:$0xff]  ;;  %v1390_v19 = vld [vmem:[#allocation2 + $0x10] sm:$0xff] }
   0xd   :  { %155 = vmatpush.msra.mxu3 %v1349_v7  ;;  %78 = vmatpush.msra.mxu0 %v52_v11  ;;  %v1396_v20 = vld [vmem:[#allocation2] sm:$0xff] }
   0xe   :  { %134 = vmatpush.msra.mxu2 %v1355_v9  ;;  %257 = vmatpush.msrb.mxu1 %v1330_v0  ;;  %v54_v22 = vld [vmem:[%s1638_s3] sm:$0x3] }
   0xf   :  { %156 = vmatpush.msra.mxu3 %v1357_v10  ;;  %79 = vmatpush.msra.mxu0 %v50_v12  ;;  %v57_v23 = vperm.slane %v54_v22, 1  ;;  %v56_v29 = vperm.slane %v54_v22, 0 }
  0x10   :  { %135 = vmatpush.msra.mxu2 %v1368_v13  ;;  %1083 = vmatmul.msk.f32.vlgmr.msra.gmra.mxu0 %vm60_vm0, %v49_v5 }
  0x11   :  { %157 = vmatpush.msra.mxu3 %v1370_v14  ;;  %237 = vmatpush.msrb.mxu0 %v1347_v6 }
  0x12   :  { %136 = vmatpush.msra.mxu2 %v1375_v15  ;;  %258 = vmatpush.msrb.mxu1 %v1332_v1 }
  0x13   :  { %158 = vmatpush.msra.mxu3 %v1377_v16  ;;  %238 = vmatpush.msrb.mxu0 %v1352_v8 }
  0x14   :  { %137 = vmatpush.msra.mxu2 %v1382_v17  ;;  %259 = vmatpush.msrb.mxu1 %v1335_v2 }
  0x15   :  { %159 = vmatpush.msra.mxu3 %v1385_v18  ;;  %239 = vmatpush.msrb.mxu0 %v1355_v9 }
  0x16   :  { %160 = vmatmul.f32.vlgmr.msra.gmra.mxu3 %v1274_v21  ;;  %138 = vmatpush.msra.mxu2 %v1390_v19 }
  0x17   :  { %240 = vmatpush.msrb.mxu0 %v1368_v13  ;;  %260 = vmatpush.msrb.mxu1 %v1349_v7 }
  0x18   :  { %139 = vmatpush.msra.mxu2 %v1396_v20  ;;  %360 = vmatpush.msrb.mxu3 %v1330_v0 }
  0x19   :  { %140 = vmatmul.f32.vlgmr.msra.gmra.mxu2 %v1274_v21  ;;  %241 = vmatpush.msrb.mxu0 %v1375_v15 }
  0x1a   :  { %261 = vmatpush.msrb.mxu1 %v1357_v10  ;;  %340 = vmatpush.msrb.mxu2 %v1347_v6 }
  0x1b   :  { %242 = vmatpush.msrb.mxu0 %v1382_v17  ;;  %361 = vmatpush.msrb.mxu3 %v1332_v1 }
  0x1c   :  { %262 = vmatpush.msrb.mxu1 %v1370_v14  ;;  %341 = vmatpush.msrb.mxu2 %v1352_v8 }
  0x1d   :  { %243 = vmatpush.msrb.mxu0 %v1390_v19  ;;  %362 = vmatpush.msrb.mxu3 %v1335_v2 }
  0x1e   :  { %263 = vmatpush.msrb.mxu1 %v1377_v16  ;;  %342 = vmatpush.msrb.mxu2 %v1355_v9 }
  0x1f   :  { %244 = vmatpush.msrb.mxu0 %v1396_v20  ;;  %363 = vmatpush.msrb.mxu3 %v1349_v7 }
  0x20   :  { %264 = vmatpush.msrb.mxu1 %v1385_v18  ;;  %343 = vmatpush.msrb.mxu2 %v1368_v13 }
  0x21   :  { %364 = vmatpush.msrb.mxu3 %v1357_v10  ;;  %443 = vmatpush.msra.mxu0 %v1347_v6 }
  0x22   :  { %344 = vmatpush.msrb.mxu2 %v1375_v15  ;;  %463 = vmatpush.msra.mxu1 %v1330_v0 }
  0x23   :  { %365 = vmatpush.msrb.mxu3 %v1370_v14  ;;  %444 = vmatpush.msra.mxu0 %v1352_v8 }
  0x24   :  { %345 = vmatpush.msrb.mxu2 %v1382_v17  ;;  %464 = vmatpush.msra.mxu1 %v1332_v1 }
  0x25   :  { %366 = vmatpush.msrb.mxu3 %v1377_v16  ;;  %445 = vmatpush.msra.mxu0 %v1355_v9 }
  0x26   :  { %346 = vmatpush.msrb.mxu2 %v1390_v19  ;;  %465 = vmatpush.msra.mxu1 %v1335_v2 }
  0x27   :  { %367 = vmatpush.msrb.mxu3 %v1385_v18  ;;  %446 = vmatpush.msra.mxu0 %v1368_v13 }
  0x28   :  { %347 = vmatpush.msrb.mxu2 %v1396_v20  ;;  %466 = vmatpush.msra.mxu1 %v1349_v7 }
  0x29   :  { %447 = vmatpush.msra.mxu0 %v1375_v15  ;;  %566 = vmatpush.msra.mxu3 %v1330_v0 }
  0x2a   :  { %546 = vmatpush.msra.mxu2 %v1347_v6  ;;  %467 = vmatpush.msra.mxu1 %v1357_v10 }
  0x2b   :  { %448 = vmatpush.msra.mxu0 %v1382_v17  ;;  %567 = vmatpush.msra.mxu3 %v1332_v1 }
  0x2c   :  { %547 = vmatpush.msra.mxu2 %v1352_v8  ;;  %468 = vmatpush.msra.mxu1 %v1370_v14 }
  0x2d   :  { %449 = vmatpush.msra.mxu0 %v1390_v19  ;;  %568 = vmatpush.msra.mxu3 %v1335_v2 }
  0x2e   :  { %548 = vmatpush.msra.mxu2 %v1355_v9  ;;  %469 = vmatpush.msra.mxu1 %v1377_v16 }
  0x2f   :  { %450 = vmatpush.msra.mxu0 %v1396_v20  ;;  %569 = vmatpush.msra.mxu3 %v1349_v7 }
  0x30   :  { %549 = vmatpush.msra.mxu2 %v1368_v13  ;;  %470 = vmatpush.msra.mxu1 %v1385_v18 }
  0x31   :  { %570 = vmatpush.msra.mxu3 %v1357_v10 }
  0x32   :  { %550 = vmatpush.msra.mxu2 %v1375_v15 }
  0x33   :  { %571 = vmatpush.msra.mxu3 %v1370_v14 }
  0x34   :  { %551 = vmatpush.msra.mxu2 %v1382_v17 }
  0x35   :  { %572 = vmatpush.msra.mxu3 %v1377_v16 }
  0x36   :  { %552 = vmatpush.msra.mxu2 %v1390_v19 }
  0x37   :  { %573 = vmatpush.msra.mxu3 %v1385_v18 }
  0x38   :  { %553 = vmatpush.msra.mxu2 %v1396_v20 }
  0x89   :  { %v101_v24 = vpop.f32.mrf.mxu1 }
  0x8a   :  { %v1462_v25 = vadd.f32 %v101_v24, %v57_v23 }
  0x8c   :  { %v223_v12 = vrot.slane %v1462_v25, 1 }
  0x8d   :  { %v81_v30 = vpop.f32.mrf.mxu0 }
  0x8e   :  { %v1466_v31 = vadd.f32 %v81_v30, %v56_v29 }
  0x99   :  { %v161_v26 = vpop.f32.mrf.mxu3 }
  0x9a   :  { %v162_v27 = vadd.f32 %v161_v26, %v1462_v25  ;;  %v222_v26 = vrot.slane %v1466_v31, 1 }
  0x9c   :  { %1123 = vtanh.f32 %v162_v27  ;;  %v141_v32 = vpop.f32.mrf.mxu2  ;;  %v1086_v53 = vmul.f32 -1.442695, %v162_v27 }
  0x9d   :  { %v142_v33 = vadd.f32 %v141_v32, %v1466_v31 }
  0x9f   :  { %v1085_v34 = vmul.f32 -1.442695, %v142_v33 }
  0xa1   :  { %1125 = vpow2.f32 %v1085_v34 }
  0xa2   :  { %v1124_v28 = vpop.eup %1123 }
  0xa3   :  { %205 = vrot.lane.b32.xlu0 %v1124_v28, %s1275_s25 }
  0xa7   :  { %v1126_v35 = vpop.eup %1125 }
  0xa8   :  { %v170_v36 = vadd.f32 1.0, %v1126_v35 }
  0xaa   :  { %1127 = vrcp.f32 %v170_v36  ;;  %vm177_vm1 = vweird.f32 %v170_v36  ;;  %v183_v41 = vand.u32 2147483648, %v170_v36  ;;  %v181_v43 = vand.u32 2147483647, %v170_v36 }
  0xac   :  { %v184_v44 = vor.u32 1.1754944e-38, %v183_v41  ;;  %vm182_vm4 = vcmp.eq.f32.partialorder %v181_v43, 8.507059e+37 }
  0xb0   :  { %v1128_v37 = vpop.eup %1127 }
  0xb1   :  { %v173_v38 = vmul.f32 %v1128_v37, %v170_v36  ;;  %vm178_vm2 = vweird.f32 %v1128_v37 }
  0xb2   :  { %vm179_vm3 = vmor %vm177_vm1, %vm178_vm2 }
  0xb3   :  { %v174_v39 = vsub.f32 1.0, %v173_v38 }
  0xb5   :  { %v175_v40 = vmul.f32 %v1128_v37, %v174_v39 }
  0xb7   :  { %v176_v42 = vadd.f32 %v1128_v37, %v175_v40 }
  0xb9   :  { %v180_v45 = vsel %vm179_vm3, %v1128_v37, %v176_v42 }
  0xba   :  { %v185_v47 = vsel %vm182_vm4, %v184_v44, %v180_v45 }
  0xbb   :  { %v203_v49 = vmul.f32 0.0, %v185_v47 }
 0x115   :  { %v206_v46 = vpop.permute.xlu0 %205 }
 0x116   :  { %v208_v48 = vmul.f32 %v206_v46, %v185_v47 }
 0x118   :  { %210 = vrot.lane.b32.xlu0 %v208_v48, %s1275_s25 }
 0x18a   :  { %v211_v50 = vpop.permute.xlu0 %210 }
 0x18b   :  { %v1470_v51 = vadd.f32 %v211_v50, %v203_v49 }
 0x18d   :  { %1129 = vtanh.f32 %v1470_v51 }
 0x18e   :  { %1131 = vpow2.f32 %v1086_v53 }
 0x193   :  { %v1130_v52 = vpop.eup %1129 }
 0x194   :  { %216 = vrot.lane.b32.xlu1 %v1130_v52, %s1275_s25  ;;  %v1132_v54 = vpop.eup %1131 }
 0x195   :  { %v171_v55 = vadd.f32 1.0, %v1132_v54 }
 0x197   :  { %1133 = vrcp.f32 %v171_v55  ;;  %v198_v61 = vand.u32 2147483648, %v171_v55  ;;  %vm192_vm6 = vweird.f32 %v171_v55  ;;  %v196_v62 = vand.u32 2147483647, %v171_v55 }
 0x199   :  { %v199_v3 = vor.u32 1.1754944e-38, %v198_v61  ;;  %vm197_vm8 = vcmp.eq.f32.partialorder %v196_v62, 8.507059e+37 }
 0x19d   :  { %v1134_v56 = vpop.eup %1133 }
 0x19e   :  { %v188_v57 = vmul.f32 %v1134_v56, %v171_v55  ;;  %vm193_vm5 = vweird.f32 %v1134_v56 }
 0x19f   :  { %vm194_vm7 = vmor %vm192_vm6, %vm193_vm5 }
 0x1a0   :  { %v189_v58 = vsub.f32 1.0, %v188_v57 }
 0x1a2   :  { %v190_v59 = vmul.f32 %v1134_v56, %v189_v58 }
 0x1a4   :  { %v191_v60 = vadd.f32 %v1134_v56, %v190_v59 }
 0x1a6   :  { %v195_v63 = vsel %vm194_vm7, %v1134_v56, %v191_v60 }
 0x1a7   :  { %v200_v4 = vsel %vm197_vm8, %v199_v3, %v195_v63  ;;  %v326_v63 = vrot.slane %v1462_v25, 2 }
 0x206   :  { %v217_v5 = vpop.permute.xlu1 %216 }
 0x207   :  { %v219_v11 = vmul.f32 %v217_v5, %v200_v4 }
 0x209   :  { %1087 = vmatmul.msk.f32.vlgmr.msrb.gmra.mxu0 %vm120_vm9, %v219_v11  ;;  %1088 = vmatmul.msk.f32.vlgmr.msrb.gmra.mxu1 %vm120_vm9, %v219_v11 }
 0x20a   :  { %649 = vmatpush.msrb.mxu0 %v1347_v6  ;;  %669 = vmatpush.msrb.mxu1 %v1330_v0 }
 0x20c   :  { %650 = vmatpush.msrb.mxu0 %v1352_v8  ;;  %670 = vmatpush.msrb.mxu1 %v1332_v1 }
 0x20e   :  { %651 = vmatpush.msrb.mxu0 %v1355_v9  ;;  %671 = vmatpush.msrb.mxu1 %v1335_v2 }
 0x210   :  { %652 = vmatpush.msrb.mxu0 %v1368_v13  ;;  %672 = vmatpush.msrb.mxu1 %v1349_v7 }
 0x212   :  { %653 = vmatpush.msrb.mxu0 %v1375_v15  ;;  %673 = vmatpush.msrb.mxu1 %v1357_v10 }
 0x214   :  { %654 = vmatpush.msrb.mxu0 %v1382_v17  ;;  %674 = vmatpush.msrb.mxu1 %v1370_v14 }
 0x216   :  { %655 = vmatpush.msrb.mxu0 %v1390_v19  ;;  %675 = vmatpush.msrb.mxu1 %v1377_v16 }
 0x218   :  { %656 = vmatpush.msrb.mxu0 %v1396_v20  ;;  %676 = vmatpush.msrb.mxu1 %v1385_v18 }
 0x286   :  { %v266_v21 = vpop.f32.mrf.mxu1  ;;  %v246_v24 = vpop.f32.mrf.mxu0 }
 0x287   :  { %v267_v22 = vadd.f32 %v266_v21, %v223_v12  ;;  %v247_v27 = vadd.f32 %v246_v24, %v222_v26  ;;  %v325_v12 = vrot.slane %v1466_v31, 2 }
 0x289   :  { %1135 = vtanh.f32 %v267_v22  ;;  %v1089_v28 = vmul.f32 -1.442695, %v247_v27  ;;  %v1090_v48 = vmul.f32 -1.442695, %v267_v22 }
 0x28b   :  { %1137 = vpow2.f32 %v1089_v28 }
 0x28f   :  { %v1136_v23 = vpop.eup %1135 }
 0x290   :  { %310 = vrot.lane.b32.xlu1 %v1136_v23, %s1275_s25 }
 0x291   :  { %v1138_v29 = vpop.eup %1137 }
 0x292   :  { %v275_v30 = vadd.f32 1.0, %v1138_v29 }
 0x294   :  { %1139 = vrcp.f32 %v275_v30  ;;  %v288_v37 = vand.u32 2147483648, %v275_v30  ;;  %vm282_vm11 = vweird.f32 %v275_v30  ;;  %v286_v38 = vand.u32 2147483647, %v275_v30 }
 0x296   :  { %v289_v40 = vor.u32 1.1754944e-38, %v288_v37  ;;  %vm287_vm13 = vcmp.eq.f32.partialorder %v286_v38, 8.507059e+37 }
 0x29a   :  { %v1140_v32 = vpop.eup %1139 }
 0x29b   :  { %v278_v33 = vmul.f32 %v1140_v32, %v275_v30  ;;  %vm283_vm10 = vweird.f32 %v1140_v32 }
 0x29c   :  { %vm284_vm12 = vmor %vm282_vm11, %vm283_vm10 }
 0x29d   :  { %v279_v34 = vsub.f32 1.0, %v278_v33 }
 0x29f   :  { %v280_v35 = vmul.f32 %v1140_v32, %v279_v34 }
 0x2a1   :  { %v281_v36 = vadd.f32 %v1140_v32, %v280_v35 }
 0x2a3   :  { %v285_v39 = vsel %vm284_vm12, %v1140_v32, %v281_v36 }
 0x2a4   :  { %v290_v42 = vsel %vm287_vm13, %v289_v40, %v285_v39 }
 0x2a5   :  { %v308_v44 = vmul.f32 %v290_v42, %v1470_v51 }
 0x302   :  { %v311_v41 = vpop.permute.xlu1 %310 }
 0x303   :  { %v313_v43 = vmul.f32 %v311_v41, %v290_v42 }
 0x305   :  { %315 = vrot.lane.b32.xlu2 %v313_v43, %s1275_s25 }
 0x35f   :  { %v316_v45 = vpop.permute.xlu2 %315 }
 0x360   :  { %v1497_v46 = vadd.f32 %v316_v45, %v308_v44 }
 0x362   :  { %1141 = vtanh.f32 %v1497_v46 }
 0x363   :  { %1143 = vpow2.f32 %v1090_v48 }
 0x368   :  { %v1142_v47 = vpop.eup %1141 }
 0x369   :  { %321 = vrot.lane.b32.xlu2 %v1142_v47, %s1275_s25  ;;  %v1144_v49 = vpop.eup %1143 }
 0x36a   :  { %v276_v50 = vadd.f32 1.0, %v1144_v49 }
 0x36c   :  { %1145 = vrcp.f32 %v276_v50  ;;  %v303_v51 = vand.u32 2147483648, %v276_v50  ;;  %vm297_vm15 = vweird.f32 %v276_v50  ;;  %v301_v57 = vand.u32 2147483647, %v276_v50 }
 0x36e   :  { %v304_v59 = vor.u32 1.1754944e-38, %v303_v51  ;;  %vm302_vm2 = vcmp.eq.f32.partialorder %v301_v57, 8.507059e+37 }
 0x372   :  { %v1146_v52 = vpop.eup %1145 }
 0x373   :  { %v293_v53 = vmul.f32 %v1146_v52, %v276_v50  ;;  %vm298_vm14 = vweird.f32 %v1146_v52 }
 0x374   :  { %vm299_vm1 = vmor %vm297_vm15, %vm298_vm14 }
 0x375   :  { %v294_v54 = vsub.f32 1.0, %v293_v53 }
 0x377   :  { %v295_v55 = vmul.f32 %v1146_v52, %v294_v54 }
 0x379   :  { %v296_v56 = vadd.f32 %v1146_v52, %v295_v55 }
 0x37b   :  { %v300_v58 = vsel %vm299_vm1, %v1146_v52, %v296_v56 }
 0x37c   :  { %v305_v60 = vsel %vm302_vm2, %v304_v59, %v300_v58 }
 0x3c3   :  { %v322_v61 = vpop.permute.xlu2 %321 }
 0x3c4   :  { %v324_v62 = vmul.f32 %v322_v61, %v305_v60 }
 0x3c6   :  { %1091 = vmatmul.msk.f32.vlgmr.msrb.gmra.mxu2 %vm120_vm9, %v324_v62  ;;  %1092 = vmatmul.msk.f32.vlgmr.msrb.gmra.mxu3 %vm120_vm9, %v324_v62 }
 0x3c7   :  { %752 = vmatpush.msrb.mxu2 %v1347_v6  ;;  %772 = vmatpush.msrb.mxu3 %v1330_v0 }
 0x3c9   :  { %753 = vmatpush.msrb.mxu2 %v1352_v8  ;;  %773 = vmatpush.msrb.mxu3 %v1332_v1 }
 0x3cb   :  { %754 = vmatpush.msrb.mxu2 %v1355_v9  ;;  %774 = vmatpush.msrb.mxu3 %v1335_v2 }
 0x3cd   :  { %755 = vmatpush.msrb.mxu2 %v1368_v13  ;;  %775 = vmatpush.msrb.mxu3 %v1349_v7 }
 0x3cf   :  { %756 = vmatpush.msrb.mxu2 %v1375_v15  ;;  %776 = vmatpush.msrb.mxu3 %v1357_v10 }
 0x3d1   :  { %757 = vmatpush.msrb.mxu2 %v1382_v17  ;;  %777 = vmatpush.msrb.mxu3 %v1370_v14 }
 0x3d3   :  { %758 = vmatpush.msrb.mxu2 %v1390_v19  ;;  %778 = vmatpush.msrb.mxu3 %v1377_v16 }
 0x3d5   :  { %759 = vmatpush.msrb.mxu2 %v1396_v20  ;;  %779 = vmatpush.msrb.mxu3 %v1385_v18 }
 0x449   :  { %v369_v3 = vpop.f32.mrf.mxu3  ;;  %v349_v11 = vpop.f32.mrf.mxu2 }
 0x44a   :  { %v370_v4 = vadd.f32 %v369_v3, %v326_v63  ;;  %v350_v21 = vadd.f32 %v349_v11, %v325_v12 }
 0x44c   :  { %1147 = vtanh.f32 %v370_v4  ;;  %v1093_v22 = vmul.f32 -1.442695, %v350_v21  ;;  %v1094_v43 = vmul.f32 -1.442695, %v370_v4 }
 0x44e   :  { %1149 = vpow2.f32 %v1093_v22 }
 0x452   :  { %v1148_v5 = vpop.eup %1147 }
 0x453   :  { %413 = vrot.lane.b32.xlu0 %v1148_v5, %s1275_s25 }
 0x454   :  { %v1150_v23 = vpop.eup %1149 }
 0x455   :  { %v378_v24 = vadd.f32 1.0, %v1150_v23 }
 0x457   :  { %1151 = vrcp.f32 %v378_v24  ;;  %v391_v32 = vand.u32 2147483648, %v378_v24  ;;  %vm385_vm4 = vweird.f32 %v378_v24  ;;  %v389_v33 = vand.u32 2147483647, %v378_v24 }
 0x459   :  { %v392_v35 = vor.u32 1.1754944e-38, %v391_v32  ;;  %vm390_vm6 = vcmp.eq.f32.partialorder %v389_v33, 8.507059e+37 }
 0x45d   :  { %v1152_v26 = vpop.eup %1151 }
 0x45e   :  { %v381_v27 = vmul.f32 %v1152_v26, %v378_v24  ;;  %vm386_vm3 = vweird.f32 %v1152_v26 }
 0x45f   :  { %vm387_vm5 = vmor %vm385_vm4, %vm386_vm3 }
 0x460   :  { %v382_v28 = vsub.f32 1.0, %v381_v27 }
 0x462   :  { %v383_v29 = vmul.f32 %v1152_v26, %v382_v28 }
 0x464   :  { %v384_v30 = vadd.f32 %v1152_v26, %v383_v29 }
 0x466   :  { %v388_v34 = vsel %vm387_vm5, %v1152_v26, %v384_v30 }
 0x467   :  { %v393_v37 = vsel %vm390_vm6, %v392_v35, %v388_v34 }
 0x468   :  { %v411_v39 = vmul.f32 %v393_v37, %v1497_v46 }
 0x4c5   :  { %v414_v36 = vpop.permute.xlu0 %413 }
 0x4c6   :  { %v416_v38 = vmul.f32 %v414_v36, %v393_v37  ;;  %v532_v37 = vrot.slane %v1462_v25, 4 }
 0x4c8   :  { %418 = vrot.lane.b32.xlu1 %v416_v38, %s1275_s25 }
 0x53a   :  { %v419_v40 = vpop.permute.xlu1 %418 }
 0x53b   :  { %v1524_v41 = vadd.f32 %v419_v40, %v411_v39 }
 0x53d   :  { %1153 = vtanh.f32 %v1524_v41 }
 0x53e   :  { %1155 = vpow2.f32 %v1094_v43 }
 0x543   :  { %v1154_v42 = vpop.eup %1153 }
 0x544   :  { %424 = vrot.lane.b32.xlu2 %v1154_v42, %s1275_s25  ;;  %v1156_v44 = vpop.eup %1155  ;;  %v531_v42 = vrot.slane %v1466_v31, 4 }
 0x545   :  { %v379_v45 = vadd.f32 1.0, %v1156_v44 }
 0x547   :  { %1157 = vrcp.f32 %v379_v45  ;;  %v406_v46 = vand.u32 2147483648, %v379_v45  ;;  %vm400_vm8 = vweird.f32 %v379_v45  ;;  %v404_v53 = vand.u32 2147483647, %v379_v45 }
 0x549   :  { %v407_v55 = vor.u32 1.1754944e-38, %v406_v46  ;;  %vm405_vm11 = vcmp.eq.f32.partialorder %v404_v53, 8.507059e+37 }
 0x54d   :  { %v1158_v47 = vpop.eup %1157 }
 0x54e   :  { %v396_v48 = vmul.f32 %v1158_v47, %v379_v45  ;;  %vm401_vm7 = vweird.f32 %v1158_v47 }
 0x54f   :  { %vm402_vm10 = vmor %vm400_vm8, %vm401_vm7 }
 0x550   :  { %v397_v49 = vsub.f32 1.0, %v396_v48 }
 0x552   :  { %v398_v50 = vmul.f32 %v1158_v47, %v397_v49 }
 0x554   :  { %v399_v52 = vadd.f32 %v1158_v47, %v398_v50 }
 0x556   :  { %v403_v54 = vsel %vm402_vm10, %v1158_v47, %v399_v52 }
 0x557   :  { %v408_v56 = vsel %vm405_vm11, %v407_v55, %v403_v54 }
 0x59e   :  { %v425_v51 = vpop.permute.xlu2 %424 }
 0x59f   :  { %v427_v57 = vmul.f32 %v425_v51, %v408_v56 }
 0x5a1   :  { %1095 = vmatmul.msk.f32.vlgmr.msra.gmra.mxu0 %vm120_vm9, %v427_v57  ;;  %1096 = vmatmul.msk.f32.vlgmr.msra.gmra.mxu1 %vm120_vm9, %v427_v57 }
 0x5a2   :  { %855 = vmatpush.msra.mxu0 %v1347_v6  ;;  %875 = vmatpush.msra.mxu1 %v1330_v0  ;;  %v429_v0 = vrot.slane %v1462_v25, 3 }
 0x5a4   :  { %856 = vmatpush.msra.mxu0 %v1352_v8  ;;  %876 = vmatpush.msra.mxu1 %v1332_v1  ;;  %v428_v8 = vrot.slane %v1466_v31, 3 }
 0x5a6   :  { %857 = vmatpush.msra.mxu0 %v1355_v9  ;;  %877 = vmatpush.msra.mxu1 %v1335_v2 }
 0x5a8   :  { %858 = vmatpush.msra.mxu0 %v1368_v13  ;;  %878 = vmatpush.msra.mxu1 %v1349_v7 }
 0x5aa   :  { %859 = vmatpush.msra.mxu0 %v1375_v15  ;;  %879 = vmatpush.msra.mxu1 %v1357_v10 }
 0x5ac   :  { %860 = vmatpush.msra.mxu0 %v1382_v17  ;;  %880 = vmatpush.msra.mxu1 %v1370_v14 }
 0x5ae   :  { %861 = vmatpush.msra.mxu0 %v1390_v19  ;;  %881 = vmatpush.msra.mxu1 %v1377_v16 }
 0x5b0   :  { %862 = vmatpush.msra.mxu0 %v1396_v20  ;;  %882 = vmatpush.msra.mxu1 %v1385_v18 }
 0x61e   :  { %v472_v1 = vpop.f32.mrf.mxu1  ;;  %v452_v7 = vpop.f32.mrf.mxu0 }
 0x61f   :  { %v473_v2 = vadd.f32 %v472_v1, %v429_v0  ;;  %v453_v9 = vadd.f32 %v452_v7, %v428_v8 }
 0x621   :  { %1159 = vtanh.f32 %v473_v2  ;;  %v1097_v10 = vmul.f32 -1.442695, %v453_v9  ;;  %v1098_v12 = vmul.f32 -1.442695, %v473_v2 }
 0x623   :  { %1161 = vpow2.f32 %v1097_v10 }
 0x627   :  { %v1160_v6 = vpop.eup %1159 }
 0x628   :  { %516 = vrot.lane.b32.xlu0 %v1160_v6, %s1275_s25 }
 0x629   :  { %v1162_v13 = vpop.eup %1161 }
 0x62a   :  { %v481_v14 = vadd.f32 1.0, %v1162_v13 }
 0x62c   :  { %1163 = vrcp.f32 %v481_v14  ;;  %v494_v20 = vand.u32 2147483648, %v481_v14  ;;  %vm488_vm13 = vweird.f32 %v481_v14  ;;  %v492_v58 = vand.u32 2147483647, %v481_v14 }
 0x62e   :  { %v495_v60 = vor.u32 1.1754944e-38, %v494_v20  ;;  %vm493_vm15 = vcmp.eq.f32.partialorder %v492_v58, 8.507059e+37 }
 0x632   :  { %v1164_v15 = vpop.eup %1163 }
 0x633   :  { %v484_v16 = vmul.f32 %v1164_v15, %v481_v14  ;;  %vm489_vm12 = vweird.f32 %v1164_v15 }
 0x634   :  { %vm490_vm14 = vmor %vm488_vm13, %vm489_vm12 }
 0x635   :  { %v485_v17 = vsub.f32 1.0, %v484_v16 }
 0x637   :  { %v486_v18 = vmul.f32 %v1164_v15, %v485_v17 }
 0x639   :  { %v487_v19 = vadd.f32 %v1164_v15, %v486_v18 }
 0x63b   :  { %v491_v59 = vsel %vm490_vm14, %v1164_v15, %v487_v19 }
 0x63c   :  { %v496_v62 = vsel %vm493_vm15, %v495_v60, %v491_v59 }
 0x63d   :  { %v514_v3 = vmul.f32 %v496_v62, %v1524_v41 }
 0x69a   :  { %v517_v61 = vpop.permute.xlu0 %516 }
 0x69b   :  { %v519_v63 = vmul.f32 %v517_v61, %v496_v62  ;;  %v635_v62 = vrot.slane %v1462_v25, 5 }
 0x69d   :  { %521 = vrot.lane.b32.xlu1 %v519_v63, %s1275_s25 }
 0x70f   :  { %v522_v4 = vpop.permute.xlu1 %521 }
 0x710   :  { %v524_v5 = vadd.f32 %v522_v4, %v514_v3 }
 0x712   :  { %1165 = vtanh.f32 %v524_v5 }
 0x713   :  { %1167 = vpow2.f32 %v1098_v12 }
 0x718   :  { %v1166_v11 = vpop.eup %1165 }
 0x719   :  { %527 = vrot.lane.b32.xlu2 %v1166_v11, %s1275_s25  ;;  %v1168_v21 = vpop.eup %1167  ;;  %v634_v11 = vrot.slane %v1466_v31, 5 }
 0x71a   :  { %v482_v22 = vadd.f32 1.0, %v1168_v21 }
 0x71c   :  { %1169 = vrcp.f32 %v482_v22  ;;  %v509_v29 = vand.u32 2147483648, %v482_v22  ;;  %vm503_vm2 = vweird.f32 %v482_v22  ;;  %v507_v30 = vand.u32 2147483647, %v482_v22 }
 0x71e   :  { %v510_v33 = vor.u32 1.1754944e-38, %v509_v29  ;;  %vm508_vm4 = vcmp.eq.f32.partialorder %v507_v30, 8.507059e+37 }
 0x722   :  { %v1170_v23 = vpop.eup %1169 }
 0x723   :  { %v499_v24 = vmul.f32 %v1170_v23, %v482_v22  ;;  %vm504_vm1 = vweird.f32 %v1170_v23 }
 0x724   :  { %vm505_vm3 = vmor %vm503_vm2, %vm504_vm1 }
 0x725   :  { %v500_v26 = vsub.f32 1.0, %v499_v24 }
 0x727   :  { %v501_v27 = vmul.f32 %v1170_v23, %v500_v26 }
 0x729   :  { %v502_v28 = vadd.f32 %v1170_v23, %v501_v27 }
 0x72b   :  { %v506_v32 = vsel %vm505_vm3, %v1170_v23, %v502_v28 }
 0x72c   :  { %v511_v34 = vsel %vm508_vm4, %v510_v33, %v506_v32 }
 0x773   :  { %v528_v35 = vpop.permute.xlu2 %527 }
 0x774   :  { %v530_v36 = vmul.f32 %v528_v35, %v511_v34 }
 0x776   :  { %1099 = vmatmul.msk.f32.vlgmr.msra.gmra.mxu2 %vm120_vm9, %v530_v36  ;;  %1100 = vmatmul.msk.f32.vlgmr.msra.gmra.mxu3 %vm120_vm9, %v530_v36 }
 0x7f9   :  { %v575_v38 = vpop.f32.mrf.mxu3  ;;  %v555_v41 = vpop.f32.mrf.mxu2 }
 0x7fa   :  { %v576_v39 = vadd.f32 %v575_v38, %v532_v37  ;;  %v556_v43 = vadd.f32 %v555_v41, %v531_v42 }
 0x7fc   :  { %1171 = vtanh.f32 %v576_v39  ;;  %v1101_v44 = vmul.f32 -1.442695, %v556_v43  ;;  %v1102_v8 = vmul.f32 -1.442695, %v576_v39 }
 0x7fe   :  { %1173 = vpow2.f32 %v1101_v44 }
 0x802   :  { %v1172_v40 = vpop.eup %1171 }
 0x803   :  { %619 = vrot.lane.b32.xlu0 %v1172_v40, %s1275_s25 }
 0x804   :  { %v1174_v45 = vpop.eup %1173 }
 0x805   :  { %v584_v47 = vadd.f32 1.0, %v1174_v45 }
 0x807   :  { %1175 = vrcp.f32 %v584_v47  ;;  %v597_v53 = vand.u32 2147483648, %v584_v47  ;;  %vm591_vm6 = vweird.f32 %v584_v47  ;;  %v595_v54 = vand.u32 2147483647, %v584_v47 }
 0x809   :  { %v598_v56 = vor.u32 1.1754944e-38, %v597_v53  ;;  %vm596_vm8 = vcmp.eq.f32.partialorder %v595_v54, 8.507059e+37 }
 0x80d   :  { %v1176_v48 = vpop.eup %1175 }
 0x80e   :  { %v587_v49 = vmul.f32 %v1176_v48, %v584_v47  ;;  %vm592_vm5 = vweird.f32 %v1176_v48 }
 0x80f   :  { %vm593_vm7 = vmor %vm591_vm6, %vm592_vm5 }
 0x810   :  { %v588_v50 = vsub.f32 1.0, %v587_v49 }
 0x812   :  { %v589_v52 = vmul.f32 %v1176_v48, %v588_v50 }
 0x814   :  { %v590_v46 = vadd.f32 %v1176_v48, %v589_v52 }
 0x816   :  { %v594_v55 = vsel %vm593_vm7, %v1176_v48, %v590_v46 }
 0x817   :  { %v599_v57 = vsel %vm596_vm8, %v598_v56, %v594_v55 }
 0x818   :  { %v617_v1 = vmul.f32 %v599_v57, %v524_v5 }
 0x875   :  { %v620_v51 = vpop.permute.xlu0 %619 }
 0x876   :  { %v622_v0 = vmul.f32 %v620_v51, %v599_v57  ;;  %v738_v57 = vrot.slane %v1462_v25, 6 }
 0x878   :  { %624 = vrot.lane.b32.xlu1 %v622_v0, %s1275_s25 }
 0x8ea   :  { %v625_v2 = vpop.permute.xlu1 %624 }
 0x8eb   :  { %v627_v6 = vadd.f32 %v625_v2, %v617_v1 }
 0x8ed   :  { %1177 = vtanh.f32 %v627_v6 }
 0x8ee   :  { %1179 = vpow2.f32 %v1102_v8 }
 0x8f3   :  { %v1178_v7 = vpop.eup %1177 }
 0x8f4   :  { %630 = vrot.lane.b32.xlu2 %v1178_v7, %s1275_s25  ;;  %v1180_v9 = vpop.eup %1179  ;;  %v737_v7 = vrot.slane %v1466_v31, 6 }
 0x8f5   :  { %v585_v10 = vadd.f32 1.0, %v1180_v9 }
 0x8f7   :  { %1181 = vrcp.f32 %v585_v10  ;;  %v612_v18 = vand.u32 2147483648, %v585_v10  ;;  %vm606_vm11 = vweird.f32 %v585_v10  ;;  %v610_v19 = vand.u32 2147483647, %v585_v10 }
 0x8f9   :  { %v613_v58 = vor.u32 1.1754944e-38, %v612_v18  ;;  %vm611_vm13 = vcmp.eq.f32.partialorder %v610_v19, 8.507059e+37 }
 0x8fd   :  { %v1182_v13 = vpop.eup %1181 }
 0x8fe   :  { %v602_v14 = vmul.f32 %v1182_v13, %v585_v10  ;;  %vm607_vm10 = vweird.f32 %v1182_v13 }
 0x8ff   :  { %vm608_vm12 = vmor %vm606_vm11, %vm607_vm10 }
 0x900   :  { %v603_v15 = vsub.f32 1.0, %v602_v14 }
 0x902   :  { %v604_v16 = vmul.f32 %v1182_v13, %v603_v15 }
 0x904   :  { %v605_v17 = vadd.f32 %v1182_v13, %v604_v16 }
 0x906   :  { %v609_v20 = vsel %vm608_vm12, %v1182_v13, %v605_v17 }
 0x907   :  { %v614_v59 = vsel %vm611_vm13, %v613_v58, %v609_v20 }
 0x94e   :  { %v631_v60 = vpop.permute.xlu2 %630 }
 0x94f   :  { %v633_v61 = vmul.f32 %v631_v60, %v614_v59 }
 0x951   :  { %1103 = vmatmul.msk.f32.vlgmr.msrb.gmra.mxu0 %vm120_vm9, %v633_v61  ;;  %1104 = vmatmul.msk.f32.vlgmr.msrb.gmra.mxu1 %vm120_vm9, %v633_v61 }
 0x9ce   :  { %v678_v63 = vpop.f32.mrf.mxu1  ;;  %v658_v5 = vpop.f32.mrf.mxu0 }
 0x9cf   :  { %v679_v3 = vadd.f32 %v678_v63, %v635_v62  ;;  %v659_v12 = vadd.f32 %v658_v5, %v634_v11 }
 0x9d1   :  { %1183 = vtanh.f32 %v679_v3  ;;  %v1105_v21 = vmul.f32 -1.442695, %v659_v12  ;;  %v1106_v42 = vmul.f32 -1.442695, %v679_v3 }
 0x9d3   :  { %1185 = vpow2.f32 %v1105_v21 }
 0x9d7   :  { %v1184_v4 = vpop.eup %1183 }
 0x9d8   :  { %722 = vrot.lane.b32.xlu0 %v1184_v4, %s1275_s25 }
 0x9d9   :  { %v1186_v22 = vpop.eup %1185 }
 0x9da   :  { %v687_v23 = vadd.f32 1.0, %v1186_v22 }
 0x9dc   :  { %1187 = vrcp.f32 %v687_v23  ;;  %v700_v30 = vand.u32 2147483648, %v687_v23  ;;  %vm694_vm15 = vweird.f32 %v687_v23  ;;  %v698_v32 = vand.u32 2147483647, %v687_v23 }
 0x9de   :  { %v701_v34 = vor.u32 1.1754944e-38, %v700_v30  ;;  %vm699_vm2 = vcmp.eq.f32.partialorder %v698_v32, 8.507059e+37 }
 0x9e2   :  { %v1188_v24 = vpop.eup %1187 }
 0x9e3   :  { %v690_v26 = vmul.f32 %v1188_v24, %v687_v23  ;;  %vm695_vm14 = vweird.f32 %v1188_v24 }
 0x9e4   :  { %vm696_vm1 = vmor %vm694_vm15, %vm695_vm14 }
 0x9e5   :  { %v691_v27 = vsub.f32 1.0, %v690_v26 }
 0x9e7   :  { %v692_v28 = vmul.f32 %v1188_v24, %v691_v27 }
 0x9e9   :  { %v693_v29 = vadd.f32 %v1188_v24, %v692_v28 }
 0x9eb   :  { %v697_v33 = vsel %vm696_vm1, %v1188_v24, %v693_v29 }
 0x9ec   :  { %v702_v36 = vsel %vm699_vm2, %v701_v34, %v697_v33 }
 0x9ed   :  { %v720_v38 = vmul.f32 %v702_v36, %v627_v6 }
 0xa4a   :  { %v723_v35 = vpop.permute.xlu0 %722 }
 0xa4b   :  { %v725_v37 = vmul.f32 %v723_v35, %v702_v36  ;;  %v841_v36 = vrot.slane %v1462_v25, 7 }
 0xa4d   :  { %727 = vrot.lane.b32.xlu1 %v725_v37, %s1275_s25 }
 0xabf   :  { %v728_v39 = vpop.permute.xlu1 %727 }
 0xac0   :  { %v730_v40 = vadd.f32 %v728_v39, %v720_v38 }
 0xac2   :  { %1189 = vtanh.f32 %v730_v40 }
 0xac3   :  { %1191 = vpow2.f32 %v1106_v42 }
 0xac8   :  { %v1190_v41 = vpop.eup %1189 }
 0xac9   :  { %733 = vrot.lane.b32.xlu2 %v1190_v41, %s1275_s25  ;;  %v1192_v43 = vpop.eup %1191  ;;  %v840_v41 = vrot.slane %v1466_v31, 7 }
 0xaca   :  { %v688_v44 = vadd.f32 1.0, %v1192_v43 }
 0xacc   :  { %1193 = vrcp.f32 %v688_v44  ;;  %v715_v52 = vand.u32 2147483648, %v688_v44  ;;  %vm709_vm4 = vweird.f32 %v688_v44  ;;  %v713_v46 = vand.u32 2147483647, %v688_v44 }
 0xace   :  { %v716_v54 = vor.u32 1.1754944e-38, %v715_v52  ;;  %vm714_vm6 = vcmp.eq.f32.partialorder %v713_v46, 8.507059e+37 }
 0xad2   :  { %v1194_v45 = vpop.eup %1193 }
 0xad3   :  { %v705_v47 = vmul.f32 %v1194_v45, %v688_v44  ;;  %vm710_vm3 = vweird.f32 %v1194_v45 }
 0xad4   :  { %vm711_vm5 = vmor %vm709_vm4, %vm710_vm3 }
 0xad5   :  { %v706_v48 = vsub.f32 1.0, %v705_v47 }
 0xad7   :  { %v707_v49 = vmul.f32 %v1194_v45, %v706_v48 }
 0xad9   :  { %v708_v50 = vadd.f32 %v1194_v45, %v707_v49 }
 0xadb   :  { %v712_v53 = vsel %vm711_vm5, %v1194_v45, %v708_v50 }
 0xadc   :  { %v717_v55 = vsel %vm714_vm6, %v716_v54, %v712_v53 }
 0xb23   :  { %v734_v56 = vpop.permute.xlu2 %733 }
 0xb24   :  { %v736_v51 = vmul.f32 %v734_v56, %v717_v55 }
 0xb26   :  { %1107 = vmatmul.msk.f32.vlgmr.msrb.gmra.mxu2 %vm120_vm9, %v736_v51  ;;  %1108 = vmatmul.msk.f32.vlgmr.msrb.gmra.mxu3 %vm120_vm9, %v736_v51  ;;  %v950_v51 = vld [vmem:[%s1639_s4 + $0x38] sm:$0xff] }
 0xb27   :  { %963 = vmatpush.msra.mxu2 %v950_v51 }
 0xba9   :  { %v781_v0 = vpop.f32.mrf.mxu3  ;;  %v761_v6 = vpop.f32.mrf.mxu2 }
 0xbaa   :  { %v782_v1 = vadd.f32 %v781_v0, %v738_v57  ;;  %v762_v8 = vadd.f32 %v761_v6, %v737_v7  ;;  %v949_v57 = vld [vmem:[%s1639_s4 + $0x30] sm:$0xff]  ;;  %v948_v0 = vld [vmem:[%s1639_s4 + $0x28] sm:$0xff] }
 0xbab   :  { %964 = vmatpush.msra.mxu2 %v949_v57  ;;  %v945_v6 = vld [vmem:[%s1639_s4 + $0x10] sm:$0xff]  ;;  %v944_v7 = vld [vmem:[%s1639_s4 + $0x8] sm:$0xff] }
 0xbac   :  { %1195 = vtanh.f32 %v782_v1  ;;  %v1109_v9 = vmul.f32 -1.442695, %v762_v8  ;;  %v1110_v11 = vmul.f32 -1.442695, %v782_v1  ;;  %v947_v1 = vld [vmem:[%s1639_s4 + $0x20] sm:$0xff] }
 0xbad   :  { %965 = vmatpush.msra.mxu2 %v948_v0 }
 0xbae   :  { %1197 = vpow2.f32 %v1109_v9 }
 0xbaf   :  { %966 = vmatpush.msra.mxu2 %v947_v1 }
 0xbb2   :  { %v1196_v2 = vpop.eup %1195 }
 0xbb3   :  { %825 = vrot.lane.b32.xlu0 %v1196_v2, %s1275_s25  ;;  %v946_v2 = vld [vmem:[%s1639_s4 + $0x18] sm:$0xff] }
 0xbb4   :  { %v1198_v10 = vpop.eup %1197  ;;  %967 = vmatpush.msra.mxu2 %v946_v2 }
 0xbb5   :  { %v790_v13 = vadd.f32 1.0, %v1198_v10 }
 0xbb6   :  { %968 = vmatpush.msra.mxu2 %v945_v6 }
 0xbb7   :  { %1199 = vrcp.f32 %v790_v13  ;;  %v803_v19 = vand.u32 2147483648, %v790_v13  ;;  %vm797_vm8 = vweird.f32 %v790_v13  ;;  %v801_v20 = vand.u32 2147483647, %v790_v13 }
 0xbb8   :  { %969 = vmatpush.msra.mxu2 %v944_v7 }
 0xbb9   :  { %v804_v59 = vor.u32 1.1754944e-38, %v803_v19  ;;  %vm802_vm11 = vcmp.eq.f32.partialorder %v801_v20, 8.507059e+37 }
 0xbbd   :  { %v1200_v14 = vpop.eup %1199 }
 0xbbe   :  { %v793_v15 = vmul.f32 %v1200_v14, %v790_v13  ;;  %vm798_vm7 = vweird.f32 %v1200_v14 }
 0xbbf   :  { %vm799_vm10 = vmor %vm797_vm8, %vm798_vm7 }
 0xbc0   :  { %v794_v16 = vsub.f32 1.0, %v793_v15 }
 0xbc2   :  { %v795_v17 = vmul.f32 %v1200_v14, %v794_v16 }
 0xbc4   :  { %v796_v18 = vadd.f32 %v1200_v14, %v795_v17  ;;  %v943_v17 = vld [vmem:[%s1639_s4] sm:$0xff] }
 0xbc5   :  { %970 = vmatpush.msra.mxu2 %v943_v17 }
 0xbc6   :  { %v800_v58 = vsel %vm799_vm10, %v1200_v14, %v796_v18  ;;  %v977_v18 = vld [vmem:[%s1641_s6 + $0x8] sm:$0xff] }
 0xbc7   :  { %v805_v61 = vsel %vm802_vm11, %v804_v59, %v800_v58  ;;  %996 = vmatpush.msra.mxu3 %v977_v18 }
 0xbc8   :  { %v823_v63 = vmul.f32 %v805_v61, %v730_v40 }
 0xc25   :  { %v826_v60 = vpop.permute.xlu0 %825 }
 0xc26   :  { %v828_v62 = vmul.f32 %v826_v60, %v805_v61 }
 0xc28   :  { %830 = vrot.lane.b32.xlu1 %v828_v62, %s1275_s25 }
 0xc9a   :  { %v831_v3 = vpop.permute.xlu1 %830 }
 0xc9b   :  { %v1572_v4 = vadd.f32 %v831_v3, %v823_v63 }
 0xc9d   :  { %1201 = vtanh.f32 %v1572_v4 }
 0xc9e   :  { %1203 = vpow2.f32 %v1110_v11 }
 0xca3   :  { %v1202_v5 = vpop.eup %1201 }
 0xca4   :  { %836 = vrot.lane.b32.xlu2 %v1202_v5, %s1275_s25  ;;  %v1204_v12 = vpop.eup %1203 }
 0xca5   :  { %v791_v21 = vadd.f32 1.0, %v1204_v12  ;;  %v976_v12 = vld [vmem:[%s1641_s6] sm:$0xff] }
 0xca6   :  { %997 = vmatpush.msra.mxu3 %v976_v12 }
 0xca7   :  { %1205 = vrcp.f32 %v791_v21  ;;  %v818_v28 = vand.u32 2147483648, %v791_v21  ;;  %vm812_vm13 = vweird.f32 %v791_v21  ;;  %v816_v29 = vand.u32 2147483647, %v791_v21 }
 0xca9   :  { %v819_v32 = vor.u32 1.1754944e-38, %v818_v28  ;;  %vm817_vm15 = vcmp.eq.f32.partialorder %v816_v29, 8.507059e+37  ;;  %v978_v29 = vld [vmem:[%s1642_s7] sm:$0x1] }
 0xcad   :  { %v1206_v22 = vpop.eup %1205 }
 0xcae   :  { %v808_v23 = vmul.f32 %v1206_v22, %v791_v21  ;;  %vm813_vm12 = vweird.f32 %v1206_v22  ;;  %v951_v21 = vld [vmem:[%s1640_s5] sm:$0x1] }
 0xcaf   :  { %vm814_vm14 = vmor %vm812_vm13, %vm813_vm12 }
 0xcb0   :  { %v809_v24 = vsub.f32 1.0, %v808_v23 }
 0xcb2   :  { %v810_v26 = vmul.f32 %v1206_v22, %v809_v24 }
 0xcb4   :  { %v811_v27 = vadd.f32 %v1206_v22, %v810_v26  ;;  %v1002_v26 = vlaneseq }
 0xcb6   :  { %v815_v30 = vsel %vm814_vm14, %v1206_v22, %v811_v27  ;;  %v1003_v27 = vshrl.u32 %v1002_v26, 7 }
 0xcb7   :  { %v820_v33 = vsel %vm817_vm15, %v819_v32, %v815_v30  ;;  %v1005_v30 = vand.u32 127, %v1002_v26 }
 0xcb8   :  { %v1010_v28 = vand.u32 3, %v1003_v27 }
 0xcba   :  { %v1030_v32 = vadd.s32 8, %v1010_v28  ;;  %vm1019_vm11 = vcmp.eq.s32.totalorder %v1005_v30, %v1010_v28 }
 0xcfe   :  { %v837_v34 = vpop.permute.xlu2 %836 }
 0xcff   :  { %v839_v35 = vmul.f32 %v837_v34, %v820_v33  ;;  %v1024_v33 = vadd.s32 4, %v1010_v28 }
 0xd01   :  { %1111 = vmatmul.msk.f32.vlgmr.msra.gmra.mxu0 %vm120_vm9, %v839_v35  ;;  %1112 = vmatmul.msk.f32.vlgmr.msra.gmra.mxu1 %vm120_vm9, %v839_v35  ;;  %vm1025_vm10 = vcmp.eq.s32.totalorder %v1005_v30, %v1024_v33 }
 0xd7e   :  { %v884_v37 = vpop.f32.mrf.mxu1  ;;  %v864_v40 = vpop.f32.mrf.mxu0 }
 0xd7f   :  { %v885_v38 = vadd.f32 %v884_v37, %v841_v36  ;;  %v865_v42 = vadd.f32 %v864_v40, %v840_v41  ;;  %v1036_v37 = vadd.s32 12, %v1010_v28 }
 0xd81   :  { %1207 = vtanh.f32 %v885_v38  ;;  %v1113_v43 = vmul.f32 -1.442695, %v865_v42  ;;  %v1114_v14 = vmul.f32 -1.442695, %v885_v38  ;;  %vm1037_vm12 = vcmp.eq.s32.totalorder %v1005_v30, %v1036_v37 }
 0xd83   :  { %1209 = vpow2.f32 %v1113_v43 }
 0xd87   :  { %v1208_v39 = vpop.eup %1207 }
 0xd88   :  { %928 = vrot.lane.b32.xlu0 %v1208_v39, %s1275_s25 }
 0xd89   :  { %v1210_v44 = vpop.eup %1209 }
 0xd8a   :  { %v893_v45 = vadd.f32 1.0, %v1210_v44 }
 0xd8c   :  { %1211 = vrcp.f32 %v893_v45  ;;  %v906_v52 = vand.u32 2147483648, %v893_v45  ;;  %vm900_vm2 = vweird.f32 %v893_v45  ;;  %v904_v46 = vand.u32 2147483647, %v893_v45 }
 0xd8e   :  { %v907_v54 = vor.u32 1.1754944e-38, %v906_v52  ;;  %vm905_vm4 = vcmp.eq.f32.partialorder %v904_v46, 8.507059e+37 }
 0xd92   :  { %v1212_v47 = vpop.eup %1211 }
 0xd93   :  { %v896_v48 = vmul.f32 %v1212_v47, %v893_v45  ;;  %vm901_vm1 = vweird.f32 %v1212_v47 }
 0xd94   :  { %vm902_vm3 = vmor %vm900_vm2, %vm901_vm1 }
 0xd95   :  { %v897_v49 = vsub.f32 1.0, %v896_v48  ;;  %v1043_v48 = vld [vmem:[%s1643_s8 + $0x8] sm:$0xff] }
 0xd97   :  { %v898_v50 = vmul.f32 %v1212_v47, %v897_v49 }
 0xd99   :  { %v899_v25 = vadd.f32 %v1212_v47, %v898_v50 }
 0xd9b   :  { %v903_v53 = vsel %vm902_vm3, %v1212_v47, %v899_v25  ;;  %v1042_v47 = vld [vmem:[%s1643_s8] sm:$0xff] }
 0xd9c   :  { %v908_v55 = vsel %vm905_vm4, %v907_v54, %v903_v53 }
 0xd9d   :  { %v926_v8 = vmul.f32 %v908_v55, %v1572_v4 }
 0xdfa   :  { %v929_v31 = vpop.permute.xlu0 %928 }
 0xdfb   :  { %v931_v56 = vmul.f32 %v929_v31, %v908_v55 }
 0xdfd   :  { %933 = vrot.lane.b32.xlu1 %v931_v56, %s1275_s25 }
 0xe6f   :  { %v934_v9 = vpop.permute.xlu1 %933 }
 0xe70   :  { %v936_v10 = vadd.f32 %v934_v9, %v926_v8 }
 0xe72   :  { %1213 = vtanh.f32 %v936_v10 }
 0xe73   :  { %1215 = vpow2.f32 %v1114_v14 }
 0xe78   :  { %v1214_v13 = vpop.eup %1213 }
 0xe79   :  { %939 = vrot.lane.b32.xlu2 %v1214_v13, %s1275_s25  ;;  %v1216_v15 = vpop.eup %1215  ;;  %s1276_s25 = smov [#allocation5]  }
 0xe7a   :  { %v894_v16 = vadd.f32 1.0, %v1216_v15  ;;  %s1071_s8 = sshll.u32 %s1276_s25, 4  ;;  %s1072_s8 = int_to_ptr.vmem [resolvable:$true] %s1071_s8 }
 0xe7c   :  { %1217 = vrcp.f32 %v894_v16  ;;  %v921_v61 = vand.u32 2147483648, %v894_v16  ;;  %vm915_vm6 = vweird.f32 %v894_v16  ;;  %v919_v62 = vand.u32 2147483647, %v894_v16 }
 0xe7e   :  { %v922_v3 = vor.u32 1.1754944e-38, %v921_v61  ;;  %vm920_vm8 = vcmp.eq.f32.partialorder %v919_v62, 8.507059e+37 }
 0xe82   :  { %v1218_v19 = vpop.eup %1217 }
 0xe83   :  { %v911_v20 = vmul.f32 %v1218_v19, %v894_v16  ;;  %vm916_vm5 = vweird.f32 %v1218_v19 }
 0xe84   :  { %vm917_vm7 = vmor %vm915_vm6, %vm916_vm5 }
 0xe85   :  { %v912_v58 = vsub.f32 1.0, %v911_v20 }
 0xe87   :  { %v913_v59 = vmul.f32 %v1218_v19, %v912_v58 }
 0xe89   :  { %v914_v60 = vadd.f32 %v1218_v19, %v913_v59 }
 0xe8b   :  { %v918_v63 = vsel %vm917_vm7, %v1218_v19, %v914_v60 }
 0xe8c   :  { %v923_v4 = vsel %vm920_vm8, %v922_v3, %v918_v63 }
 0xed3   :  { %v940_v5 = vpop.permute.xlu2 %939 }
 0xed4   :  { %v942_v11 = vmul.f32 %v940_v5, %v923_v4 }
 0xed6   :  { %1115 = vmatmul.msk.f32.vlgmr.msra.gmra.mxu2 %vm120_vm9, %v942_v11  ;;  %vm1031_vm9 = vcmp.eq.s32.totalorder %v1005_v30, %v1030_v32 }
 0xf59   :  { %v972_v22 = vpop.f32.mrf.mxu2 }
 0xf5a   :  { %v973_v23 = vadd.f32 %v972_v22, %v951_v21 }
 0xf5c   :  { %v975_v24 = vmax.f32 %v973_v23, 0.0 }
 0xf5e   :  { %1116 = vmatmul.msk.f32.vlgmr.msra.gmra.mxu3 %vm60_vm0, %v975_v24 }
 0xfe1   :  { %v999_v34 = vpop.f32.mrf.mxu3 }
 0xfe2   :  { %v1000_v35 = vadd.f32 %v999_v34, %v978_v29 }
 0xfe4   :  { %v1018_v36 = vperm.slane %v1000_v35, 0 }
 0xfe6   :  { %v1032_v38 = vsel %vm1031_vm9, %v1018_v36, 0.0  ;;  %v1026_v39 = vsel %vm1025_vm10, %v1018_v36, 0.0  ;;  %v1020_v40 = vsel %vm1019_vm11, %v1018_v36, 0.0  ;;  %v1038_v44 = vsel %vm1037_vm12, %v1018_v36, 0.0 }
 0xfe7   :  { %v1033_v41 = vsel %vm60_vm0, %v1032_v38, 0.0  ;;  %v1027_v42 = vsel %vm60_vm0, %v1026_v39, 0.0  ;;  %v1021_v43 = vsel %vm60_vm0, %v1020_v40, 0.0  ;;  %v1039_v45 = vsel %vm60_vm0, %v1038_v44, 0.0 }
 0xfe8   :  { %1034 = vadd.xlane.f32.xlu2 %v1033_v41  ;;  %1028 = vadd.xlane.f32.xlu1 %v1027_v42 }
 0xfe9   :  { %1022 = vadd.xlane.f32.xlu0 %v1021_v43 }
 0xff0   :  { %1040 = vadd.xlane.f32.xlu2 %v1039_v45 }
0x105b   :  { %v1035_v49 = vpop.xlane.xlu2 %1034  ;;  %v1029_v46 = vpop.xlane.xlu1 %1028 }
0x105c   :  { %v1023_v50 = vpop.xlane.xlu0 %1022 }
0x105d   :  { %v1044_v25 = vmul.f32 %v1042_v47, %v1023_v50  ;;  %v1045_v52 = vmul.f32 %v1043_v48, %v1023_v50 }
0x105f   :  { %v1046_v53 = vadd.f32 %v1044_v25, %v1029_v46  ;;  %v1047_v54 = vadd.f32 %v1045_v52, %v1029_v46 }
0x1061   :  { %v1050_v31 = vmul.f32 0.2, %v1046_v53  ;;  %v1051_v55 = vmul.f32 0.2, %v1047_v54  ;;  %vm1048_vm13 = vcmp.ge.f32.partialorder %v1046_v53, 0.0  ;;  %vm1049_vm0 = vcmp.ge.f32.partialorder %v1047_v54, 0.0 }
0x1063   :  { %v1041_v56 = vpop.xlane.xlu2 %1040  ;;  %v1052_v51 = vsel %vm1048_vm13, %v1046_v53, %v1050_v31  ;;  %v1053_v57 = vsel %vm1049_vm0, %v1047_v54, %v1051_v55 }
0x1064   :  { %v1054_v0 = vmul.f32 %v1052_v51, %v1035_v49  ;;  %v1055_v1 = vmul.f32 %v1053_v57, %v1035_v49 }
0x1066   :  { %v1056_v2 = vadd.f32 %v1054_v0, %v1041_v56  ;;  %v1057_v6 = vadd.f32 %v1055_v1, %v1041_v56 }
0x1068   :  { %vm1058_vm14 = vcmp.ge.f32.partialorder %v1056_v2, 0.0  ;;  %vm1059_vm15 = vcmp.ge.f32.partialorder %v1057_v6, 0.0  ;;  %v1060_v7 = vmul.f32 0.2, %v1056_v2  ;;  %v1061_v8 = vmul.f32 0.2, %v1057_v6 }
0x106a   :  { %v1062_v9 = vsel %vm1058_vm14, %v1056_v2, %v1060_v7  ;;  %v1063_v10 = vsel %vm1059_vm15, %v1057_v6, %v1061_v8 }
0x106b   :  { %1064 = vst [vmem:[#allocation5] sm:$0xff] %v1062_v9 }
0x106c   :  { %1065 = vst [vmem:[#allocation5 + $0x8] sm:$0xff] %v1063_v10 }
0x106d   :  { %1076 = dma.vmem_to_hbm [thread:$0]  %s1072_s8, 256, %s1074_s27, [#allocation4]  }
0x106e   :  { %1269 = dma.done.wait [#allocation4], 256  }
0x106f   :  { %1270 = vsyncadd [#allocation4], 4294967040 }
0x1070   :  { %1081 = vsyncpa [#allocation3], 1 }
0x1071   :  { %1082 = vsyncpa [#allocation4], 1 }

</bundles_post_ra>
